<compile_context>
chip_gen: v7x
topology: tpu7x:2x2x1
jax: 0.10.0
libtpu: 0.0.40
codegen_flags: <defaults>
</compile_context>

<pallas_src>
import functools

import numpy as np

import jax
import jax.numpy as jnp
from jax import lax
from jax.experimental import pallas as pl
from jax.experimental.pallas import tpu as pltpu


# ------------------------------ Pallas kernel -------------------------------

def _fused_forward_kernel(x_ref, w1_ref, b1_ref, w2_ref, b2_ref,
                          wih_ref, brnn_ref, whh_ref, wlin_ref, blin_ref,
                          o_ref, *, T, H, O):
    """Entire forward pass on VMEM-resident operands.

    x_ref    : (B, Hin*Win)         flattened input spectrogram
    w1_ref   : (Hin*Win, H1*W1*C1)  conv1 (padding + im2col folded in), b1_ref
    w2_ref   : (H1*W1*C1, T*F)      conv2 + (c,h,w)->(w, c*h) permute, b2_ref
    wih_ref  : (T*F, T*4H)          block-diag LSTM input projection, brnn_ref
    whh_ref  : (H, 4H)              LSTM recurrent weights (gate order i,f,g,o)
    wlin_ref : (T*H, T*O)           block-diag final Linear, blin_ref (1, T*O)
    o_ref    : (B, T*O)
    """
    f32 = jnp.float32

    # conv1 + ReLU: one MXU matmul, lane-dense output (N = H1*W1*C1)
    a1 = jnp.dot(x_ref[...], w1_ref[...], preferred_element_type=f32)
    a1 = jnp.maximum(a1 + b1_ref[...], 0.0)

    # conv2 + ReLU: output already in (B, T*F) LSTM feature order
    a2 = jnp.dot(a1, w2_ref[...], preferred_element_type=f32)
    a2 = jnp.maximum(a2 + b2_ref[...], 0.0)

    # hoisted LSTM input projection for every timestep at once: (B, T*4H)
    gx = jnp.dot(a2, wih_ref[...], preferred_element_type=f32) + brnn_ref[...]

    B = a2.shape[0]
    h = jnp.zeros((B, H), f32)
    c = jnp.zeros((B, H), f32)
    out = jnp.zeros((B, T * O), f32)

    whh = whh_ref[...]
    for t in range(T):                       # static unroll (T is small)
        gates = gx[:, t * 4 * H:(t + 1) * 4 * H]        # 128-lane-aligned slice
        if t > 0:                            # h == 0 at t == 0
            gates = gates + jnp.dot(h, whh, preferred_element_type=f32)
        # one sigmoid pass + one tanh pass over the full (B, 4H) gate vreg
        sig = 0.5 * jnp.tanh(0.5 * gates) + 0.5   # stable sigmoid on the EUP
        tnh = jnp.tanh(gates)
        i_g = sig[:, 0 * H:1 * H]
        f_g = sig[:, 1 * H:2 * H]
        g_g = tnh[:, 2 * H:3 * H]
        o_g = sig[:, 3 * H:4 * H]
        c = f_g * c + i_g * g_g
        h = o_g * jnp.tanh(c)
        # final Linear accumulated in registers (single writeback at the end)
        out = out + jnp.dot(h, wlin_ref[t * H:(t + 1) * H, :],
                            preferred_element_type=f32)

    o_ref[...] = (out + blin_ref[...]).astype(o_ref.dtype)


def rnn_model_forward(fused, x):
    """x: (B, input_size, time) float32 -> (B, T', output_size)."""
    B = x.shape[0]
    T, H, O = fused['T'], fused['H'], fused['O']
    x_flat = x.reshape(B, -1)            # row-major (freq-major, time-minor)
    kernel = functools.partial(_fused_forward_kernel, T=T, H=H, O=O)
    out = pl.pallas_call(
        kernel,
        out_shape=jax.ShapeDtypeStruct((B, T * O), jnp.float32),
        in_specs=[pl.BlockSpec(memory_space=pltpu.MemorySpace.VMEM)] * 10,
        out_specs=pl.BlockSpec(memory_space=pltpu.MemorySpace.VMEM),
    )(x_flat, fused['w1big'], fused['b1big'], fused['w2big'], fused['b2big'],
      fused['wih_blk'], fused['brnn_big'], fused['w_hh'],
      fused['wlin_blk'], fused['blin_big'])
    return out.reshape(B, T, O)


# --------------------------- parameter preparation ---------------------------

def init_params(key, input_size, output_size, hidden_size,
                channels=(8, 8), kernel_sizes=((5, 5), (5, 5)),
                strides=((2, 2), (2, 2))):
    """PyTorch-like raw parameters (same conventions as torch.nn modules)."""
    keys = iter(jax.random.split(key, 12))
    raw = {}
    in_ch = 1
    h_out = input_size
    conv_params = []
    for out_ch, k, s in zip(channels, kernel_sizes, strides):
        fan_in = in_ch * k[0] * k[1]
        bound = 1.0 / float(fan_in) ** 0.5
        w = jax.random.uniform(next(keys), (out_ch, in_ch, k[0], k[1]),
                               jnp.float32, -bound, bound)
        b = jax.random.uniform(next(keys), (out_ch,), jnp.float32, -bound, bound)
        conv_params.append((w, b))
        in_ch = out_ch
        h_out = (h_out + 2 * (k[0] // 2) - k[0]) // s[0] + 1
    raw['conv1_w'], raw['conv1_b'] = conv_params[0]
    raw['conv2_w'], raw['conv2_b'] = conv_params[1]
    rnn_in = h_out * in_ch                     # = h_out * out_channels
    bound = 1.0 / float(hidden_size) ** 0.5
    # gate columns ordered (i, f, g, o); b_ih + b_hh fused into one bias
    raw['w_ih'] = jax.random.uniform(next(keys), (rnn_in, 4 * hidden_size),
                                     jnp.float32, -bound, bound)
    raw['w_hh'] = jax.random.uniform(next(keys), (hidden_size, 4 * hidden_size),
                                     jnp.float32, -bound, bound)
    raw['b_rnn'] = jax.random.uniform(next(keys), (1, 4 * hidden_size),
                                      jnp.float32, -bound, bound)
    raw['w_lin'] = jax.random.uniform(next(keys), (hidden_size, output_size),
                                      jnp.float32, -bound, bound)
    raw['b_lin'] = jax.random.uniform(next(keys), (1, output_size),
                                      jnp.float32, -bound, bound)
    return raw


def _conv_out(n, k, s, p):
    return (n + 2 * p - k) // s + 1


def prepare_fused_params(raw, input_size, time_steps, hidden_size, output_size):
    """Fold padding/im2col/permute into dense matmul weights (init-time only)."""
    w1 = np.asarray(raw['conv1_w'])            # (C1, 1, 5, 5)
    b1 = np.asarray(raw['conv1_b'])
    w2 = np.asarray(raw['conv2_w'])            # (C2, C1, 5, 5)
    b2 = np.asarray(raw['conv2_b'])

    C1, _, K1h, K1w = w1.shape
    C2, _, K2h, K2w = w2.shape
    s = 2                                      # module default stride
    p1h, p1w = K1h // 2, K1w // 2
    p2h, p2w = K2h // 2, K2w // 2

    Hin, Win = input_size, time_steps
    H1, W1 = _conv_out(Hin, K1h, s, p1h), _conv_out(Win, K1w, s, p1w)
    H2, W2 = _conv_out(H1, K2h, s, p2h), _conv_out(W1, K2w, s, p2w)
    T = W2                                     # output time frames
    F = C2 * H2                                # LSTM input size
    HH = hidden_size
    O = output_size

    # conv1 as one dense matmul: (Hin*Win) -> (H1*W1*C1); zero padding folded.
    w1big = np.zeros((Hin * Win, H1 * W1 * C1), np.float32)
    for co in range(C1):
        for ki in range(K1h):
            for kj in range(K1w):
                for ho in range(H1):
                    hi = s * ho + ki - p1h
                    if not (0 <= hi < Hin):
                        continue
                    for wo in range(W1):
                        wi = s * wo + kj - p1w
                        if not (0 <= wi < Win):
                            continue
                        w1big[hi * Win + wi,
                              (ho * W1 + wo) * C1 + co] += w1[co, 0, ki, kj]
    b1big = np.tile(b1, H1 * W1)[None, :].astype(np.float32)

    # conv2 as one dense matmul: (H1*W1*C1) -> (T*F); output columns are
    # time-major with feature index k = c2*H2 + h2, i.e. exactly the
    # reshape(b, c*h, w).permute(0, 2, 1) of the reference module.
    w2big = np.zeros((H1 * W1 * C1, T * F), np.float32)
    for c2 in range(C2):
        for c1 in range(C1):
            for ki in range(K2h):
                for kj in range(K2w):
                    for h2 in range(H2):
                        h1 = s * h2 + ki - p2h
                        if not (0 <= h1 < H1):
                            continue
                        for w2o in range(W2):
                            w1o = s * w2o + kj - p2w
                            if not (0 <= w1o < W1):
                                continue
                            w2big[(h1 * W1 + w1o) * C1 + c1,
                                  w2o * F + c2 * H2 + h2] += w2[c2, c1, ki, kj]
    b2big = np.zeros((1, T * F), np.float32)
    for w2o in range(W2):
        for c2 in range(C2):
            for h2 in range(H2):
                b2big[0, w2o * F + c2 * H2 + h2] = b2[c2]

    # block-diagonal input projection (hoists x@W_ih out of the recurrence)
    wih = np.asarray(raw['w_ih'])              # (F, 4H)
    wih_blk = np.zeros((T * F, T * 4 * HH), np.float32)
    for t in range(T):
        wih_blk[t * F:(t + 1) * F, t * 4 * HH:(t + 1) * 4 * HH] = wih
    brnn_big = np.tile(np.asarray(raw['b_rnn']).reshape(1, 4 * HH), (1, T))

    # block-diagonal final Linear, consumed one row-block per timestep
    wlin = np.asarray(raw['w_lin'])            # (H, O)
    wlin_blk = np.zeros((T * HH, T * O), np.float32)
    for t in range(T):
        wlin_blk[t * HH:(t + 1) * HH, t * O:(t + 1) * O] = wlin
    blin_big = np.tile(np.asarray(raw['b_lin']).reshape(1, O), (1, T))

    return {
        'w1big': jnp.asarray(w1big), 'b1big': jnp.asarray(b1big),
        'w2big': jnp.asarray(w2big), 'b2big': jnp.asarray(b2big),
        'wih_blk': jnp.asarray(wih_blk), 'brnn_big': jnp.asarray(brnn_big),
        'w_hh': raw['w_hh'],
        'wlin_blk': jnp.asarray(wlin_blk), 'blin_big': jnp.asarray(blin_big),
        'T': T, 'H': HH, 'O': O,
    }


# ---------------------------- pure-JAX reference -----------------------------

def reference_forward(raw, x):
    """Pure-JAX/XLA reference of the PyTorch module's forward pass."""
    hp = lax.Precision.HIGHEST
    z = x[:, None, :, :]                                   # NCHW, C=1
    for w, b in ((raw['conv1_w'], raw['conv1_b']),
                 (raw['conv2_w'], raw['conv2_b'])):
        z = lax.conv_general_dilated(
            z, w, window_strides=(2, 2), padding=((2, 2), (2, 2)),
            dimension_numbers=('NCHW', 'OIHW', 'NCHW'), precision=hp)
        z = jnp.maximum(z + b[None, :, None, None], 0.0)
    b_, c_, h_, w_ = z.shape
    feats = jnp.transpose(z.reshape(b_, c_ * h_, w_), (0, 2, 1))   # (B, T, F)

    H = raw['w_hh'].shape[0]

    def step(carry, x_t):
        h, c = carry
        gates = (jnp.dot(x_t, raw['w_ih'], precision=hp)
                 + jnp.dot(h, raw['w_hh'], precision=hp) + raw['b_rnn'][0])
        i = jax.nn.sigmoid(gates[:, 0 * H:1 * H])
        f = jax.nn.sigmoid(gates[:, 1 * H:2 * H])
        g = jnp.tanh(gates[:, 2 * H:3 * H])
        o = jax.nn.sigmoid(gates[:, 3 * H:4 * H])
        c = f * c + i * g
        h = o * jnp.tanh(c)
        return (h, c), h

    h0 = jnp.zeros((b_, H), jnp.float32)
    _, hs = lax.scan(step, (h0, h0), jnp.transpose(feats, (1, 0, 2)))
    hs = jnp.transpose(hs, (1, 0, 2))                      # (B, T, H)
    return jnp.dot(hs, raw['w_lin'], precision=hp) + raw['b_lin'][0]


# ----------------------------------- main ------------------------------------

if __name__ == "__main__":
    INPUT_SIZE = 16   # frequency bins (conv H)
    TIME = 16         # time steps before the convs (conv W)
    BATCH = 2
    HIDDEN = 32
    OUTPUT = 10

    key = jax.random.PRNGKey(0)
    pkey, xkey = jax.random.split(key)
    raw = init_params(pkey, INPUT_SIZE, OUTPUT, HIDDEN)
    fused = prepare_fused_params(raw, INPUT_SIZE, TIME, HIDDEN, OUTPUT)
    x = jax.random.normal(xkey, (BATCH, INPUT_SIZE, TIME), jnp.float32)

    out = rnn_model_forward(fused, x)
    out = jax.block_until_ready(out)
    assert out.shape == (BATCH, 4, OUTPUT), out.shape   # 16 -> 8 -> 4 frames

    ref = jax.block_until_ready(reference_forward(raw, x))
    max_err = float(jnp.max(jnp.abs(out - ref)))
    assert jnp.allclose(out, ref, atol=2e-2, rtol=2e-2), max_err

    print("KERNEL_OK")
</pallas_src>

<mosaic_0001>
module attributes {stable_mosaic.version = 11 : i64} {
  func.func @_fused_forward_kernel(%arg0: memref<2x256xf32, #tpu.memory_space<vmem>>, %arg1: memref<256x512xf32, #tpu.memory_space<vmem>>, %arg2: memref<1x512xf32, #tpu.memory_space<vmem>>, %arg3: memref<512x128xf32, #tpu.memory_space<vmem>>, %arg4: memref<1x128xf32, #tpu.memory_space<vmem>>, %arg5: memref<128x512xf32, #tpu.memory_space<vmem>>, %arg6: memref<1x512xf32, #tpu.memory_space<vmem>>, %arg7: memref<32x128xf32, #tpu.memory_space<vmem>>, %arg8: memref<128x40xf32, #tpu.memory_space<vmem>>, %arg9: memref<1x40xf32, #tpu.memory_space<vmem>>, %arg10: memref<2x40xf32, #tpu.memory_space<vmem>>) attributes {dimension_semantics = [], scalar_prefetch = 0 : i64, scratch_operands = 0 : i64, tpu.core_type = #tpu.core_type<tc>} {
    %c0 = arith.constant 0 : index
    %c0_0 = arith.constant 0 : index
    %0 = vector.load %arg0[%c0, %c0_0] : memref<2x256xf32, #tpu.memory_space<vmem>>, vector<2x256xf32>
    %c0_1 = arith.constant 0 : index
    %c0_2 = arith.constant 0 : index
    %1 = vector.load %arg1[%c0_1, %c0_2] : memref<256x512xf32, #tpu.memory_space<vmem>>, vector<256x512xf32>
    %cst = arith.constant dense<0.000000e+00> : vector<2x512xf32>
    %2 = tpu.matmul %0, %1, %cst {dimension_numbers = #tpu.dot_dimension_numbers<[1], [0], [0], [1], [0, 0, 1, 1], [], []>} : vector<2x256xf32>, vector<256x512xf32>, vector<2x512xf32> -> vector<2x512xf32>
    %c0_3 = arith.constant 0 : index
    %c0_4 = arith.constant 0 : index
    %3 = vector.load %arg2[%c0_3, %c0_4] : memref<1x512xf32, #tpu.memory_space<vmem>>, vector<1x512xf32>
    %4 = vector.broadcast %3 : vector<1x512xf32> to vector<2x512xf32>
    %5 = arith.addf %2, %4 : vector<2x512xf32>
    %cst_5 = arith.constant 0.000000e+00 : f32
    %6 = vector.broadcast %cst_5 : f32 to vector<2x512xf32>
    %7 = arith.maximumf %5, %6 : vector<2x512xf32>
    %c0_6 = arith.constant 0 : index
    %c0_7 = arith.constant 0 : index
    %8 = vector.load %arg3[%c0_6, %c0_7] : memref<512x128xf32, #tpu.memory_space<vmem>>, vector<512x128xf32>
    %cst_8 = arith.constant dense<0.000000e+00> : vector<2x128xf32>
    %9 = tpu.matmul %7, %8, %cst_8 {dimension_numbers = #tpu.dot_dimension_numbers<[1], [0], [0], [1], [0, 0, 1, 1], [], []>} : vector<2x512xf32>, vector<512x128xf32>, vector<2x128xf32> -> vector<2x128xf32>
    %c0_9 = arith.constant 0 : index
    %c0_10 = arith.constant 0 : index
    %10 = vector.load %arg4[%c0_9, %c0_10] : memref<1x128xf32, #tpu.memory_space<vmem>>, vector<1x128xf32>
    %11 = vector.broadcast %10 : vector<1x128xf32> to vector<2x128xf32>
    %12 = arith.addf %9, %11 : vector<2x128xf32>
    %cst_11 = arith.constant 0.000000e+00 : f32
    %13 = vector.broadcast %cst_11 : f32 to vector<2x128xf32>
    %14 = arith.maximumf %12, %13 : vector<2x128xf32>
    %c0_12 = arith.constant 0 : index
    %c0_13 = arith.constant 0 : index
    %15 = vector.load %arg5[%c0_12, %c0_13] : memref<128x512xf32, #tpu.memory_space<vmem>>, vector<128x512xf32>
    %cst_14 = arith.constant dense<0.000000e+00> : vector<2x512xf32>
    %16 = tpu.matmul %14, %15, %cst_14 {dimension_numbers = #tpu.dot_dimension_numbers<[1], [0], [0], [1], [0, 0, 1, 1], [], []>} : vector<2x128xf32>, vector<128x512xf32>, vector<2x512xf32> -> vector<2x512xf32>
    %c0_15 = arith.constant 0 : index
    %c0_16 = arith.constant 0 : index
    %17 = vector.load %arg6[%c0_15, %c0_16] : memref<1x512xf32, #tpu.memory_space<vmem>>, vector<1x512xf32>
    %18 = vector.broadcast %17 : vector<1x512xf32> to vector<2x512xf32>
    %19 = arith.addf %16, %18 : vector<2x512xf32>
    %cst_17 = arith.constant 0.000000e+00 : f32
    %20 = vector.broadcast %cst_17 : f32 to vector<2x32xf32>
    %cst_18 = arith.constant 0.000000e+00 : f32
    %21 = vector.broadcast %cst_18 : f32 to vector<2x40xf32>
    %c0_19 = arith.constant 0 : index
    %c0_20 = arith.constant 0 : index
    %22 = vector.load %arg7[%c0_19, %c0_20] : memref<32x128xf32, #tpu.memory_space<vmem>>, vector<32x128xf32>
    %23 = vector.extract_strided_slice %19 {offsets = [0, 0], sizes = [2, 128], strides = [1, 1]} : vector<2x512xf32> to vector<2x128xf32>
    %cst_21 = arith.constant 5.000000e-01 : f32
    %24 = vector.broadcast %cst_21 : f32 to vector<2x128xf32>
    %25 = arith.mulf %24, %23 : vector<2x128xf32>
    %26 = math.tanh %25 : vector<2x128xf32>
    %cst_22 = arith.constant 5.000000e-01 : f32
    %27 = vector.broadcast %cst_22 : f32 to vector<2x128xf32>
    %28 = arith.mulf %27, %26 : vector<2x128xf32>
    %cst_23 = arith.constant 5.000000e-01 : f32
    %29 = vector.broadcast %cst_23 : f32 to vector<2x128xf32>
    %30 = arith.addf %28, %29 : vector<2x128xf32>
    %31 = math.tanh %23 : vector<2x128xf32>
    %32 = vector.extract_strided_slice %30 {offsets = [0, 0], sizes = [2, 32], strides = [1, 1]} : vector<2x128xf32> to vector<2x32xf32>
    %33 = vector.extract_strided_slice %30 {offsets = [0, 32], sizes = [2, 32], strides = [1, 1]} : vector<2x128xf32> to vector<2x32xf32>
    %34 = vector.extract_strided_slice %31 {offsets = [0, 64], sizes = [2, 32], strides = [1, 1]} : vector<2x128xf32> to vector<2x32xf32>
    %35 = vector.extract_strided_slice %30 {offsets = [0, 96], sizes = [2, 32], strides = [1, 1]} : vector<2x128xf32> to vector<2x32xf32>
    %36 = arith.mulf %33, %20 : vector<2x32xf32>
    %37 = arith.mulf %32, %34 : vector<2x32xf32>
    %38 = arith.addf %36, %37 : vector<2x32xf32>
    %39 = math.tanh %38 : vector<2x32xf32>
    %40 = arith.mulf %35, %39 : vector<2x32xf32>
    %c0_24 = arith.constant 0 : index
    %c0_25 = arith.constant 0 : index
    %41 = vector.load %arg8[%c0_24, %c0_25] : memref<128x40xf32, #tpu.memory_space<vmem>>, vector<32x40xf32>
    %cst_26 = arith.constant dense<0.000000e+00> : vector<2x40xf32>
    %42 = tpu.matmul %40, %41, %cst_26 {dimension_numbers = #tpu.dot_dimension_numbers<[1], [0], [0], [1], [0, 0, 1, 1], [], []>} : vector<2x32xf32>, vector<32x40xf32>, vector<2x40xf32> -> vector<2x40xf32>
    %43 = arith.addf %21, %42 : vector<2x40xf32>
    %44 = vector.extract_strided_slice %19 {offsets = [0, 128], sizes = [2, 128], strides = [1, 1]} : vector<2x512xf32> to vector<2x128xf32>
    %cst_27 = arith.constant dense<0.000000e+00> : vector<2x128xf32>
    %45 = tpu.matmul %40, %22, %cst_27 {dimension_numbers = #tpu.dot_dimension_numbers<[1], [0], [0], [1], [0, 0, 1, 1], [], []>} : vector<2x32xf32>, vector<32x128xf32>, vector<2x128xf32> -> vector<2x128xf32>
    %46 = arith.addf %44, %45 : vector<2x128xf32>
    %cst_28 = arith.constant 5.000000e-01 : f32
    %47 = vector.broadcast %cst_28 : f32 to vector<2x128xf32>
    %48 = arith.mulf %47, %46 : vector<2x128xf32>
    %49 = math.tanh %48 : vector<2x128xf32>
    %cst_29 = arith.constant 5.000000e-01 : f32
    %50 = vector.broadcast %cst_29 : f32 to vector<2x128xf32>
    %51 = arith.mulf %50, %49 : vector<2x128xf32>
    %cst_30 = arith.constant 5.000000e-01 : f32
    %52 = vector.broadcast %cst_30 : f32 to vector<2x128xf32>
    %53 = arith.addf %51, %52 : vector<2x128xf32>
    %54 = math.tanh %46 : vector<2x128xf32>
    %55 = vector.extract_strided_slice %53 {offsets = [0, 0], sizes = [2, 32], strides = [1, 1]} : vector<2x128xf32> to vector<2x32xf32>
    %56 = vector.extract_strided_slice %53 {offsets = [0, 32], sizes = [2, 32], strides = [1, 1]} : vector<2x128xf32> to vector<2x32xf32>
    %57 = vector.extract_strided_slice %54 {offsets = [0, 64], sizes = [2, 32], strides = [1, 1]} : vector<2x128xf32> to vector<2x32xf32>
    %58 = vector.extract_strided_slice %53 {offsets = [0, 96], sizes = [2, 32], strides = [1, 1]} : vector<2x128xf32> to vector<2x32xf32>
    %59 = arith.mulf %56, %38 : vector<2x32xf32>
    %60 = arith.mulf %55, %57 : vector<2x32xf32>
    %61 = arith.addf %59, %60 : vector<2x32xf32>
    %62 = math.tanh %61 : vector<2x32xf32>
    %63 = arith.mulf %58, %62 : vector<2x32xf32>
    %c32 = arith.constant 32 : index
    %c0_31 = arith.constant 0 : index
    %64 = vector.load %arg8[%c32, %c0_31] : memref<128x40xf32, #tpu.memory_space<vmem>>, vector<32x40xf32>
    %cst_32 = arith.constant dense<0.000000e+00> : vector<2x40xf32>
    %65 = tpu.matmul %63, %64, %cst_32 {dimension_numbers = #tpu.dot_dimension_numbers<[1], [0], [0], [1], [0, 0, 1, 1], [], []>} : vector<2x32xf32>, vector<32x40xf32>, vector<2x40xf32> -> vector<2x40xf32>
    %66 = arith.addf %43, %65 : vector<2x40xf32>
    %67 = vector.extract_strided_slice %19 {offsets = [0, 256], sizes = [2, 128], strides = [1, 1]} : vector<2x512xf32> to vector<2x128xf32>
    %cst_33 = arith.constant dense<0.000000e+00> : vector<2x128xf32>
    %68 = tpu.matmul %63, %22, %cst_33 {dimension_numbers = #tpu.dot_dimension_numbers<[1], [0], [0], [1], [0, 0, 1, 1], [], []>} : vector<2x32xf32>, vector<32x128xf32>, vector<2x128xf32> -> vector<2x128xf32>
    %69 = arith.addf %67, %68 : vector<2x128xf32>
    %cst_34 = arith.constant 5.000000e-01 : f32
    %70 = vector.broadcast %cst_34 : f32 to vector<2x128xf32>
    %71 = arith.mulf %70, %69 : vector<2x128xf32>
    %72 = math.tanh %71 : vector<2x128xf32>
    %cst_35 = arith.constant 5.000000e-01 : f32
    %73 = vector.broadcast %cst_35 : f32 to vector<2x128xf32>
    %74 = arith.mulf %73, %72 : vector<2x128xf32>
    %cst_36 = arith.constant 5.000000e-01 : f32
    %75 = vector.broadcast %cst_36 : f32 to vector<2x128xf32>
    %76 = arith.addf %74, %75 : vector<2x128xf32>
    %77 = math.tanh %69 : vector<2x128xf32>
    %78 = vector.extract_strided_slice %76 {offsets = [0, 0], sizes = [2, 32], strides = [1, 1]} : vector<2x128xf32> to vector<2x32xf32>
    %79 = vector.extract_strided_slice %76 {offsets = [0, 32], sizes = [2, 32], strides = [1, 1]} : vector<2x128xf32> to vector<2x32xf32>
    %80 = vector.extract_strided_slice %77 {offsets = [0, 64], sizes = [2, 32], strides = [1, 1]} : vector<2x128xf32> to vector<2x32xf32>
    %81 = vector.extract_strided_slice %76 {offsets = [0, 96], sizes = [2, 32], strides = [1, 1]} : vector<2x128xf32> to vector<2x32xf32>
    %82 = arith.mulf %79, %61 : vector<2x32xf32>
    %83 = arith.mulf %78, %80 : vector<2x32xf32>
    %84 = arith.addf %82, %83 : vector<2x32xf32>
    %85 = math.tanh %84 : vector<2x32xf32>
    %86 = arith.mulf %81, %85 : vector<2x32xf32>
    %c64 = arith.constant 64 : index
    %c0_37 = arith.constant 0 : index
    %87 = vector.load %arg8[%c64, %c0_37] : memref<128x40xf32, #tpu.memory_space<vmem>>, vector<32x40xf32>
    %cst_38 = arith.constant dense<0.000000e+00> : vector<2x40xf32>
    %88 = tpu.matmul %86, %87, %cst_38 {dimension_numbers = #tpu.dot_dimension_numbers<[1], [0], [0], [1], [0, 0, 1, 1], [], []>} : vector<2x32xf32>, vector<32x40xf32>, vector<2x40xf32> -> vector<2x40xf32>
    %89 = arith.addf %66, %88 : vector<2x40xf32>
    %90 = vector.extract_strided_slice %19 {offsets = [0, 384], sizes = [2, 128], strides = [1, 1]} : vector<2x512xf32> to vector<2x128xf32>
    %cst_39 = arith.constant dense<0.000000e+00> : vector<2x128xf32>
    %91 = tpu.matmul %86, %22, %cst_39 {dimension_numbers = #tpu.dot_dimension_numbers<[1], [0], [0], [1], [0, 0, 1, 1], [], []>} : vector<2x32xf32>, vector<32x128xf32>, vector<2x128xf32> -> vector<2x128xf32>
    %92 = arith.addf %90, %91 : vector<2x128xf32>
    %cst_40 = arith.constant 5.000000e-01 : f32
    %93 = vector.broadcast %cst_40 : f32 to vector<2x128xf32>
    %94 = arith.mulf %93, %92 : vector<2x128xf32>
    %95 = math.tanh %94 : vector<2x128xf32>
    %cst_41 = arith.constant 5.000000e-01 : f32
    %96 = vector.broadcast %cst_41 : f32 to vector<2x128xf32>
    %97 = arith.mulf %96, %95 : vector<2x128xf32>
    %cst_42 = arith.constant 5.000000e-01 : f32
    %98 = vector.broadcast %cst_42 : f32 to vector<2x128xf32>
    %99 = arith.addf %97, %98 : vector<2x128xf32>
    %100 = math.tanh %92 : vector<2x128xf32>
    %101 = vector.extract_strided_slice %99 {offsets = [0, 0], sizes = [2, 32], strides = [1, 1]} : vector<2x128xf32> to vector<2x32xf32>
    %102 = vector.extract_strided_slice %99 {offsets = [0, 32], sizes = [2, 32], strides = [1, 1]} : vector<2x128xf32> to vector<2x32xf32>
    %103 = vector.extract_strided_slice %100 {offsets = [0, 64], sizes = [2, 32], strides = [1, 1]} : vector<2x128xf32> to vector<2x32xf32>
    %104 = vector.extract_strided_slice %99 {offsets = [0, 96], sizes = [2, 32], strides = [1, 1]} : vector<2x128xf32> to vector<2x32xf32>
    %105 = arith.mulf %102, %84 : vector<2x32xf32>
    %106 = arith.mulf %101, %103 : vector<2x32xf32>
    %107 = arith.addf %105, %106 : vector<2x32xf32>
    %108 = math.tanh %107 : vector<2x32xf32>
    %109 = arith.mulf %104, %108 : vector<2x32xf32>
    %c96 = arith.constant 96 : index
    %c0_43 = arith.constant 0 : index
    %110 = vector.load %arg8[%c96, %c0_43] : memref<128x40xf32, #tpu.memory_space<vmem>>, vector<32x40xf32>
    %cst_44 = arith.constant dense<0.000000e+00> : vector<2x40xf32>
    %111 = tpu.matmul %109, %110, %cst_44 {dimension_numbers = #tpu.dot_dimension_numbers<[1], [0], [0], [1], [0, 0, 1, 1], [], []>} : vector<2x32xf32>, vector<32x40xf32>, vector<2x40xf32> -> vector<2x40xf32>
    %112 = arith.addf %89, %111 : vector<2x40xf32>
    %c0_45 = arith.constant 0 : index
    %c0_46 = arith.constant 0 : index
    %113 = vector.load %arg9[%c0_45, %c0_46] : memref<1x40xf32, #tpu.memory_space<vmem>>, vector<1x40xf32>
    %114 = vector.broadcast %113 : vector<1x40xf32> to vector<2x40xf32>
    %115 = arith.addf %112, %114 : vector<2x40xf32>
    %c0_47 = arith.constant 0 : index
    %c0_48 = arith.constant 0 : index
    %116 = vector.load %arg10[%c0_47, %c0_48] : memref<2x40xf32, #tpu.memory_space<vmem>>, vector<2x40xf32>
    tpu.vector_store %arg10[%c0_47, %c0_48], %115 {strides = array<i32>} : memref<2x40xf32, #tpu.memory_space<vmem>>, vector<2x40xf32>,
    return
  }
}

</mosaic_0001>

<bundles_post_ra>
// kernel: tpu_custom_call.1
= control target key start
LH: loop header
LB: loop body
LE: loop exit
PB: predicated region body
PF: predicated region fallthrough
CT: control target
= control target key end

     0   :  { %15 = vsyncpa [#allocation3], 0  ;;  %s2390_s0 = inlined_call_operand.vmem [shape: f32[2,256], index: 0, kind: input, shape index: {}]   ;;  %s2391_s1 = inlined_call_operand.hbm [shape: f32[256,512], index: 1, kind: input, shape index: {}]   ;;  %s2392_s2 = inlined_call_operand.vmem [shape: f32[1,512], index: 2, kind: input, shape index: {}]   ;;  %s2393_s3 = inlined_call_operand.hbm [shape: f32[512,128], index: 3, kind: input, shape index: {}]   ;;  %s2394_s4 = inlined_call_operand.vmem [shape: f32[1,128], index: 4, kind: input, shape index: {}]   ;;  %s2395_s5 = inlined_call_operand.hbm [shape: f32[128,512], index: 5, kind: input, shape index: {}]   ;;  %s2396_s6 = inlined_call_operand.vmem [shape: f32[1,512], index: 6, kind: input, shape index: {}]   ;;  %s2397_s7 = inlined_call_operand.vmem [shape: f32[32,128], index: 7, kind: input, shape index: {}]   ;;  %s2398_s8 = inlined_call_operand.vmem [shape: f32[128,40], index: 8, kind: input, shape index: {}]   ;;  %s2399_s9 = inlined_call_operand.vmem [shape: f32[1,40], index: 9, kind: input, shape index: {}]   ;;  %s2400_s10 = inlined_call_operand.hbm [shape: f32[2,40], index: 10, kind: output, shape index: {}]  }
   0x1   :  { %16 = vsyncpa [#allocation6], 0 }
   0x2   :  { %17 = vsyncpa [#allocation4], 0  ;;  %s2095_s13 = smov [#allocation5]   ;;  %s2001_s17 = scalar_lea.hbm %s2393_s3, 8192 }
   0x3   :  { %s39_s14 = sshll.u32 %s2095_s13, 4  ;;  %p2002_p0 = scmp.ne.s32.totalorder %s2393_s3, %s2001_s17  ;;  %s40_s14 = int_to_ptr.vmem [resolvable:$true] %s39_s14 }
   0x4   :  { %p2005_p1 = scmp.lt.u32.totalorder %s2001_s17, %s2393_s3 }
   0x6   :  { %p2007_p2 = pnand %p2005_p1, %p2002_p0 }
   0x8   :  { %2010 = shalt.err (!%p2007_p2)
}
   0x9   :  { %s2011_s22 = scalar_lea.vmem %s40_s14, 8192  ;;  %p2016_p4 = scmp.lt.s32.totalorder %s40_s14, %s40_s14 }
   0xa   :  { %p2012_p3 = scmp.ne.s32.totalorder %s40_s14, %s2011_s22  ;;  %p2017_p5 = scmp.lt.s32.totalorder %s2011_s22, %s2011_s22 }
   0xc   :  { %p2018_p6 = por %p2017_p5, %p2016_p4 }
   0xe   :  { %p2019_p7 = pnand %p2018_p6, %p2012_p3 }
  0x10   :  { %2022 = shalt.err (!%p2019_p7)
}
  0x11   :  { %s2096_s23 = smov 128   ;;  %s2097_s24 = smov 8  }
  0x12   :  { %45 = dma.hbm_to_vmem [thread:$0]  %s2393_s3, 8192, %s40_s14, [#allocation6], %s2096_s23, %s2096_s23, %s2097_s24  }
  0x13   :  { %s2098_s27 = smov [#allocation2]   ;;  %s2023_s11 = scalar_lea.hbm %s2391_s1, 16384 }
  0x14   :  { %s25_s28 = sshll.u32 %s2098_s27, 4  ;;  %p2024_p8 = scmp.ne.s32.totalorder %s2391_s1, %s2023_s11  ;;  %s26_s28 = int_to_ptr.vmem [resolvable:$true] %s25_s28 }
  0x15   :  { %p2027_p9 = scmp.lt.u32.totalorder %s2023_s11, %s2391_s1 }
  0x17   :  { %p2029_p10 = pnand %p2027_p9, %p2024_p8 }
  0x19   :  { %2032 = shalt.err (!%p2029_p10)
}
  0x1a   :  { %s2033_s17 = scalar_lea.vmem %s26_s28, 16384  ;;  %p2038_p12 = scmp.lt.s32.totalorder %s26_s28, %s26_s28 }
  0x1b   :  { %p2034_p11 = scmp.ne.s32.totalorder %s26_s28, %s2033_s17  ;;  %p2039_p13 = scmp.lt.s32.totalorder %s2033_s17, %s2033_s17 }
  0x1d   :  { %p2040_p0 = por %p2039_p13, %p2038_p12 }
  0x1f   :  { %p2041_p1 = pnand %p2040_p0, %p2034_p11 }
  0x21   :  { %2044 = shalt.err (!%p2041_p1)
}
  0x22   :  { %s2099_s3 = smov 512   ;;  %s2100_s14 = smov 32  }
  0x23   :  { %31 = dma.hbm_to_vmem [thread:$0]  %s2391_s1, 16384, %s26_s28, [#allocation3], %s2099_s3, %s2099_s3, %s2100_s14  }
  0x24   :  { %s2101_s20 = smov [#allocation7]   ;;  %s2045_s24 = scalar_lea.hbm %s2395_s5, 8192 }
  0x25   :  { %s53_s21 = sshll.u32 %s2101_s20, 4  ;;  %p2046_p2 = scmp.ne.s32.totalorder %s2395_s5, %s2045_s24  ;;  %s54_s21 = int_to_ptr.vmem [resolvable:$true] %s53_s21 }
  0x26   :  { %p2049_p3 = scmp.lt.u32.totalorder %s2045_s24, %s2395_s5 }
  0x28   :  { %p2051_p4 = pnand %p2049_p3, %p2046_p2 }
  0x2a   :  { %2054 = shalt.err (!%p2051_p4)
}
  0x2b   :  { %s2055_s30 = scalar_lea.vmem %s54_s21, 8192  ;;  %p2060_p6 = scmp.lt.s32.totalorder %s54_s21, %s54_s21 }
  0x2c   :  { %p2056_p5 = scmp.ne.s32.totalorder %s54_s21, %s2055_s30  ;;  %p2061_p7 = scmp.lt.s32.totalorder %s2055_s30, %s2055_s30 }
  0x2e   :  { %p2062_p8 = por %p2061_p7, %p2060_p6 }
  0x30   :  { %p2063_p9 = pnand %p2062_p8, %p2056_p5 }
  0x32   :  { %2066 = shalt.err (!%p2063_p9)
}
  0x33   :  { %59 = dma.hbm_to_vmem [thread:$0]  %s2395_s5, 8192, %s54_s21, [#allocation6], %s2099_s3, %s2099_s3, %s2100_s14  }
  0x34   :  { %2089 = dma.done.wait [#allocation3], 16384  }
  0x35   :  { %2090 = vsyncadd [#allocation3], 4294950912 }
  0x36   :  { %2091 = dma.done.wait [#allocation6], 16384  }
  0x37   :  { %2092 = vsyncadd [#allocation6], 4294950912  ;;  %v79_v0 = vld [vmem:[#allocation2 + $0x8] sm:$0xff]  ;;  %v81_v2 = vld [vmem:[#allocation2 + $0x18] sm:$0xff]  ;;  %vm2105_vm0 = vmmov 0   ;;  %vm858_vm1 = vcmask 261120  }
  0x38   :  { %v83_v1 = vld [vmem:[#allocation2 + $0x28] sm:$0xff]  ;;  %v85_v4 = vld [vmem:[#allocation2 + $0x38] sm:$0xff]  ;;  %v78_v5 = vld [vmem:[#allocation2] sm:$0xff]  ;;  %vm1457_vm2 = vcmask 320512  }
  0x39   :  { %v1667_v3 = vpack.c.bf16 %v83_v1, %v79_v0  ;;  %v82_v6 = vld [vmem:[#allocation2 + $0x20] sm:$0xff]  ;;  %v1731_v7 = vpack.c.bf16 %v85_v4, %v81_v2  ;;  %v80_v9 = vld [vmem:[#allocation2 + $0x10] sm:$0xff]  ;;  %v87_v11 = vld [vmem:[#allocation2 + $0x48] sm:$0xff] }
  0x3a   :  { %v1669_v8 = vpack.c.bf16 %v82_v6, %v78_v5  ;;  %v84_v10 = vld [vmem:[#allocation2 + $0x30] sm:$0xff]  ;;  %v91_v13 = vld [vmem:[#allocation2 + $0x68] sm:$0xff]  ;;  %v89_v14 = vld [vmem:[#allocation2 + $0x58] sm:$0xff] }
  0x3b   :  { %1668 = vmatprep.subr.bf16.mxu0 %v1667_v3  ;;  %v1733_v12 = vpack.c.bf16 %v84_v10, %v80_v9  ;;  %v93_v15 = vld [vmem:[#allocation2 + $0x78] sm:$0xff]  ;;  %1732 = vmatprep.subr.bf16.mxu1 %v1731_v7  ;;  %v1671_v16 = vpack.c.bf16 %v91_v13, %v87_v11  ;;  %v86_v18 = vld [vmem:[#allocation2 + $0x40] sm:$0xff]  ;;  %v88_v20 = vld [vmem:[#allocation2 + $0x50] sm:$0xff] }
  0x3c   :  { %1670 = vmatpush1.bf16.msra.mxu0 %v1669_v8  ;;  %v1735_v17 = vpack.c.bf16 %v93_v15, %v89_v14  ;;  %v90_v19 = vld [vmem:[#allocation2 + $0x60] sm:$0xff]  ;;  %v92_v22 = vld [vmem:[#allocation2 + $0x70] sm:$0xff]  ;;  %v95_v23 = vld [vmem:[#allocation2 + $0x88] sm:$0xff] }
  0x3d   :  { %1734 = vmatpush1.bf16.msra.mxu1 %v1733_v12  ;;  %v1673_v21 = vpack.c.bf16 %v90_v19, %v86_v18  ;;  %v99_v24 = vld [vmem:[#allocation2 + $0xa8] sm:$0xff]  ;;  %1672 = vmatprep.subr.bf16.mxu0 %v1671_v16  ;;  %v1737_v25 = vpack.c.bf16 %v92_v22, %v88_v20  ;;  %v97_v27 = vld [vmem:[#allocation2 + $0x98] sm:$0xff]  ;;  %v94_v29 = vld [vmem:[#allocation2 + $0x80] sm:$0xff] }
  0x3e   :  { %1736 = vmatprep.subr.bf16.mxu1 %v1735_v17  ;;  %v1675_v26 = vpack.c.bf16 %v99_v24, %v95_v23  ;;  %v101_v28 = vld [vmem:[#allocation2 + $0xb8] sm:$0xff]  ;;  %v98_v31 = vld [vmem:[#allocation2 + $0xa0] sm:$0xff]  ;;  %v96_v32 = vld [vmem:[#allocation2 + $0x90] sm:$0xff] }
  0x3f   :  { %v1739_v30 = vpack.c.bf16 %v101_v28, %v97_v27  ;;  %v100_v33 = vld [vmem:[#allocation2 + $0xb0] sm:$0xff]  ;;  %v1677_v34 = vpack.c.bf16 %v98_v31, %v94_v29  ;;  %v103_v35 = vld [vmem:[#allocation2 + $0xc8] sm:$0xff]  ;;  %v105_v37 = vld [vmem:[#allocation2 + $0xd8] sm:$0xff] }
  0x40   :  { %1674 = vmatpush1.bf16.msra.mxu0 %v1673_v21  ;;  %v107_v36 = vld [vmem:[#allocation2 + $0xe8] sm:$0xff]  ;;  %v1741_v38 = vpack.c.bf16 %v100_v33, %v96_v32  ;;  %v109_v40 = vld [vmem:[#allocation2 + $0xf8] sm:$0xff]  ;;  %v102_v41 = vld [vmem:[#allocation2 + $0xc0] sm:$0xff] }
  0x41   :  { %1738 = vmatpush1.bf16.msra.mxu1 %v1737_v25  ;;  %1676 = vmatprep.subr.bf16.mxu0 %v1675_v26  ;;  %v1679_v39 = vpack.c.bf16 %v107_v36, %v103_v35  ;;  %v106_v42 = vld [vmem:[#allocation2 + $0xe0] sm:$0xff]  ;;  %v1743_v43 = vpack.c.bf16 %v109_v40, %v105_v37  ;;  %v104_v44 = vld [vmem:[#allocation2 + $0xd0] sm:$0xff]  ;;  %v111_v46 = vld [vmem:[#allocation2 + $0x108] sm:$0xff] }
  0x42   :  { %1740 = vmatprep.subr.bf16.mxu1 %v1739_v30  ;;  %v108_v45 = vld [vmem:[#allocation2 + $0xf0] sm:$0xff]  ;;  %v115_v47 = vld [vmem:[#allocation2 + $0x128] sm:$0xff]  ;;  %v113_v48 = vld [vmem:[#allocation2 + $0x118] sm:$0xff]  ;;  %v1681_v50 = vpack.c.bf16 %v106_v42, %v102_v41 }
  0x43   :  { %v117_v49 = vld [vmem:[#allocation2 + $0x138] sm:$0xff]  ;;  %v1745_v51 = vpack.c.bf16 %v108_v45, %v104_v44  ;;  %v1683_v52 = vpack.c.bf16 %v115_v47, %v111_v46  ;;  %v110_v53 = vld [vmem:[#allocation2 + $0x100] sm:$0xff]  ;;  %v112_v55 = vld [vmem:[#allocation2 + $0x110] sm:$0xff] }
  0x44   :  { %1678 = vmatpush1.bf16.msra.mxu0 %v1677_v34  ;;  %v114_v54 = vld [vmem:[#allocation2 + $0x120] sm:$0xff]  ;;  %v1747_v56 = vpack.c.bf16 %v117_v49, %v113_v48  ;;  %v116_v57 = vld [vmem:[#allocation2 + $0x130] sm:$0xff]  ;;  %v119_v58 = vld [vmem:[#allocation2 + $0x148] sm:$0xff] }
  0x45   :  { %1742 = vmatpush1.bf16.msra.mxu1 %v1741_v38  ;;  %1680 = vmatprep.subr.bf16.mxu0 %v1679_v39  ;;  %v123_v59 = vld [vmem:[#allocation2 + $0x168] sm:$0xff]  ;;  %v121_v60 = vld [vmem:[#allocation2 + $0x158] sm:$0xff]  ;;  %v1685_v62 = vpack.c.bf16 %v114_v54, %v110_v53  ;;  %v1749_v63 = vpack.c.bf16 %v116_v57, %v112_v55  ;;  %v118_v1 = vld [vmem:[#allocation2 + $0x140] sm:$0xff] }
  0x46   :  { %1744 = vmatprep.subr.bf16.mxu1 %v1743_v43  ;;  %v125_v61 = vld [vmem:[#allocation2 + $0x178] sm:$0xff]  ;;  %v1687_v0 = vpack.c.bf16 %v123_v59, %v119_v58  ;;  %v122_v2 = vld [vmem:[#allocation2 + $0x160] sm:$0xff]  ;;  %v120_v3 = vld [vmem:[#allocation2 + $0x150] sm:$0xff] }
  0x47   :  { %v1751_v4 = vpack.c.bf16 %v125_v61, %v121_v60  ;;  %v124_v5 = vld [vmem:[#allocation2 + $0x170] sm:$0xff]  ;;  %v127_v6 = vld [vmem:[#allocation2 + $0x188] sm:$0xff]  ;;  %v129_v8 = vld [vmem:[#allocation2 + $0x198] sm:$0xff]  ;;  %v1689_v10 = vpack.c.bf16 %v122_v2, %v118_v1 }
  0x48   :  { %1682 = vmatpush1.bf16.msra.mxu0 %v1681_v50  ;;  %v131_v7 = vld [vmem:[#allocation2 + $0x1a8] sm:$0xff]  ;;  %v133_v9 = vld [vmem:[#allocation2 + $0x1b8] sm:$0xff]  ;;  %v1753_v11 = vpack.c.bf16 %v124_v5, %v120_v3  ;;  %v126_v13 = vld [vmem:[#allocation2 + $0x180] sm:$0xff] }
  0x49   :  { %1746 = vmatpush1.bf16.msra.mxu1 %v1745_v51  ;;  %1684 = vmatprep.subr.bf16.mxu0 %v1683_v52  ;;  %v1691_v12 = vpack.c.bf16 %v131_v7, %v127_v6  ;;  %v130_v14 = vld [vmem:[#allocation2 + $0x1a0] sm:$0xff]  ;;  %v128_v15 = vld [vmem:[#allocation2 + $0x190] sm:$0xff]  ;;  %v1755_v16 = vpack.c.bf16 %v133_v9, %v129_v8  ;;  %v135_v18 = vld [vmem:[#allocation2 + $0x1c8] sm:$0xff] }
  0x4a   :  { %1748 = vmatprep.subr.bf16.mxu1 %v1747_v56  ;;  %v132_v17 = vld [vmem:[#allocation2 + $0x1b0] sm:$0xff]  ;;  %v139_v19 = vld [vmem:[#allocation2 + $0x1e8] sm:$0xff]  ;;  %v137_v20 = vld [vmem:[#allocation2 + $0x1d8] sm:$0xff]  ;;  %v1693_v22 = vpack.c.bf16 %v130_v14, %v126_v13 }
  0x4b   :  { %v141_v21 = vld [vmem:[#allocation2 + $0x1f8] sm:$0xff]  ;;  %v1757_v23 = vpack.c.bf16 %v132_v17, %v128_v15  ;;  %v1695_v24 = vpack.c.bf16 %v139_v19, %v135_v18  ;;  %v134_v25 = vld [vmem:[#allocation2 + $0x1c0] sm:$0xff]  ;;  %v136_v27 = vld [vmem:[#allocation2 + $0x1d0] sm:$0xff] }
  0x4c   :  { %1686 = vmatpush1.bf16.msra.mxu0 %v1685_v62  ;;  %v138_v26 = vld [vmem:[#allocation2 + $0x1e0] sm:$0xff]  ;;  %v1759_v28 = vpack.c.bf16 %v141_v21, %v137_v20  ;;  %v140_v29 = vld [vmem:[#allocation2 + $0x1f0] sm:$0xff]  ;;  %v143_v30 = vld [vmem:[#allocation2 + $0x208] sm:$0xff] }
  0x4d   :  { %1750 = vmatpush1.bf16.msra.mxu1 %v1749_v63  ;;  %1688 = vmatprep.subr.bf16.mxu0 %v1687_v0  ;;  %v147_v31 = vld [vmem:[#allocation2 + $0x228] sm:$0xff]  ;;  %v145_v32 = vld [vmem:[#allocation2 + $0x218] sm:$0xff]  ;;  %v1697_v34 = vpack.c.bf16 %v138_v26, %v134_v25  ;;  %v1761_v35 = vpack.c.bf16 %v140_v29, %v136_v27  ;;  %v142_v37 = vld [vmem:[#allocation2 + $0x200] sm:$0xff] }
  0x4e   :  { %1752 = vmatprep.subr.bf16.mxu1 %v1751_v4  ;;  %v149_v33 = vld [vmem:[#allocation2 + $0x238] sm:$0xff]  ;;  %v1699_v36 = vpack.c.bf16 %v147_v31, %v143_v30  ;;  %v146_v38 = vld [vmem:[#allocation2 + $0x220] sm:$0xff]  ;;  %v144_v39 = vld [vmem:[#allocation2 + $0x210] sm:$0xff] }
  0x4f   :  { %v1763_v40 = vpack.c.bf16 %v149_v33, %v145_v32  ;;  %v148_v41 = vld [vmem:[#allocation2 + $0x230] sm:$0xff]  ;;  %v151_v42 = vld [vmem:[#allocation2 + $0x248] sm:$0xff]  ;;  %v153_v44 = vld [vmem:[#allocation2 + $0x258] sm:$0xff]  ;;  %v1701_v46 = vpack.c.bf16 %v146_v38, %v142_v37 }
  0x50   :  { %1690 = vmatpush1.bf16.msra.mxu0 %v1689_v10  ;;  %v155_v43 = vld [vmem:[#allocation2 + $0x268] sm:$0xff]  ;;  %v157_v45 = vld [vmem:[#allocation2 + $0x278] sm:$0xff]  ;;  %v1765_v47 = vpack.c.bf16 %v148_v41, %v144_v39  ;;  %v150_v49 = vld [vmem:[#allocation2 + $0x240] sm:$0xff] }
  0x51   :  { %1754 = vmatpush1.bf16.msra.mxu1 %v1753_v11  ;;  %1692 = vmatprep.subr.bf16.mxu0 %v1691_v12  ;;  %v1703_v48 = vpack.c.bf16 %v155_v43, %v151_v42  ;;  %v154_v50 = vld [vmem:[#allocation2 + $0x260] sm:$0xff]  ;;  %v152_v51 = vld [vmem:[#allocation2 + $0x250] sm:$0xff]  ;;  %v1767_v52 = vpack.c.bf16 %v157_v45, %v153_v44  ;;  %v159_v54 = vld [vmem:[#allocation2 + $0x288] sm:$0xff] }
  0x52   :  { %1756 = vmatprep.subr.bf16.mxu1 %v1755_v16  ;;  %v156_v53 = vld [vmem:[#allocation2 + $0x270] sm:$0xff]  ;;  %v163_v55 = vld [vmem:[#allocation2 + $0x2a8] sm:$0xff]  ;;  %v161_v56 = vld [vmem:[#allocation2 + $0x298] sm:$0xff]  ;;  %v1705_v58 = vpack.c.bf16 %v154_v50, %v150_v49 }
  0x53   :  { %v165_v57 = vld [vmem:[#allocation2 + $0x2b8] sm:$0xff]  ;;  %v1769_v59 = vpack.c.bf16 %v156_v53, %v152_v51  ;;  %v1707_v60 = vpack.c.bf16 %v163_v55, %v159_v54  ;;  %v158_v61 = vld [vmem:[#allocation2 + $0x280] sm:$0xff]  ;;  %v160_v63 = vld [vmem:[#allocation2 + $0x290] sm:$0xff] }
  0x54   :  { %1694 = vmatpush1.bf16.msra.mxu0 %v1693_v22  ;;  %v162_v62 = vld [vmem:[#allocation2 + $0x2a0] sm:$0xff]  ;;  %v1771_v0 = vpack.c.bf16 %v165_v57, %v161_v56  ;;  %v164_v1 = vld [vmem:[#allocation2 + $0x2b0] sm:$0xff]  ;;  %v167_v2 = vld [vmem:[#allocation2 + $0x2c8] sm:$0xff] }
  0x55   :  { %1758 = vmatpush1.bf16.msra.mxu1 %v1757_v23  ;;  %1696 = vmatprep.subr.bf16.mxu0 %v1695_v24  ;;  %v171_v3 = vld [vmem:[#allocation2 + $0x2e8] sm:$0xff]  ;;  %v169_v4 = vld [vmem:[#allocation2 + $0x2d8] sm:$0xff]  ;;  %v1709_v6 = vpack.c.bf16 %v162_v62, %v158_v61  ;;  %v166_v7 = vld [vmem:[#allocation2 + $0x2c0] sm:$0xff]  ;;  %v1773_v8 = vpack.c.bf16 %v164_v1, %v160_v63 }
  0x56   :  { %1760 = vmatprep.subr.bf16.mxu1 %v1759_v28  ;;  %v173_v5 = vld [vmem:[#allocation2 + $0x2f8] sm:$0xff]  ;;  %v1711_v9 = vpack.c.bf16 %v171_v3, %v167_v2  ;;  %v170_v10 = vld [vmem:[#allocation2 + $0x2e0] sm:$0xff]  ;;  %v168_v11 = vld [vmem:[#allocation2 + $0x2d0] sm:$0xff] }
  0x57   :  { %v172_v12 = vld [vmem:[#allocation2 + $0x2f0] sm:$0xff]  ;;  %v1775_v13 = vpack.c.bf16 %v173_v5, %v169_v4  ;;  %v175_v14 = vld [vmem:[#allocation2 + $0x308] sm:$0xff]  ;;  %v2203_v16 = vld.sshfl [vmem:[%s2390_s0] sm:$0x33 pattern:$0x76325410]  ;;  %v1713_v20 = vpack.c.bf16 %v170_v10, %v166_v7 }
  0x58   :  { %1698 = vmatpush1.bf16.msra.mxu0 %v1697_v34  ;;  %v179_v15 = vld [vmem:[#allocation2 + $0x328] sm:$0xff]  ;;  %v177_v17 = vld [vmem:[#allocation2 + $0x318] sm:$0xff]  ;;  %v236_v19 = vcombine.high %v2203_v16, %v2203_v16  ;;  %v1777_v21 = vpack.c.bf16 %v172_v12, %v168_v11  ;;  %v174_v23 = vld [vmem:[#allocation2 + $0x300] sm:$0xff] }
  0x59   :  { %1762 = vmatpush1.bf16.msra.mxu1 %v1761_v35  ;;  %1700 = vmatprep.subr.bf16.mxu0 %v1699_v36  ;;  %v181_v18 = vld [vmem:[#allocation2 + $0x338] sm:$0xff]  ;;  %v1715_v22 = vpack.c.bf16 %v179_v15, %v175_v14  ;;  %v178_v24 = vld [vmem:[#allocation2 + $0x320] sm:$0xff]  ;;  %v176_v25 = vld [vmem:[#allocation2 + $0x310] sm:$0xff] }
  0x5a   :  { %1764 = vmatprep.subr.bf16.mxu1 %v1763_v40  ;;  %v1779_v26 = vpack.c.bf16 %v181_v18, %v177_v17  ;;  %v180_v27 = vld [vmem:[#allocation2 + $0x330] sm:$0xff]  ;;  %v183_v28 = vld [vmem:[#allocation2 + $0x348] sm:$0xff]  ;;  %303 = vmatprep.mubr.f32.mxu0 %v236_v19  ;;  %v185_v30 = vld [vmem:[#allocation2 + $0x358] sm:$0xff]  ;;  %v1717_v32 = vpack.c.bf16 %v178_v24, %v174_v23 }
  0x5b   :  { %v187_v29 = vld [vmem:[#allocation2 + $0x368] sm:$0xff]  ;;  %v189_v31 = vld [vmem:[#allocation2 + $0x378] sm:$0xff]  ;;  %374 = vmatprep.mubr.f32.mxu1 %v236_v19  ;;  %v1781_v33 = vpack.c.bf16 %v180_v27, %v176_v25  ;;  %v182_v35 = vld [vmem:[#allocation2 + $0x340] sm:$0xff] }
  0x5c   :  { %1702 = vmatpush1.bf16.msra.mxu0 %v1701_v46  ;;  %v1719_v34 = vpack.c.bf16 %v187_v29, %v183_v28  ;;  %v186_v36 = vld [vmem:[#allocation2 + $0x360] sm:$0xff]  ;;  %v184_v37 = vld [vmem:[#allocation2 + $0x350] sm:$0xff]  ;;  %v1783_v38 = vpack.c.bf16 %v189_v31, %v185_v30  ;;  %v191_v40 = vld [vmem:[#allocation2 + $0x388] sm:$0xff] }
  0x5d   :  { %1766 = vmatpush1.bf16.msra.mxu1 %v1765_v47  ;;  %1704 = vmatprep.subr.bf16.mxu0 %v1703_v48  ;;  %v188_v39 = vld [vmem:[#allocation2 + $0x370] sm:$0xff]  ;;  %v195_v41 = vld [vmem:[#allocation2 + $0x3a8] sm:$0xff]  ;;  %v193_v42 = vld [vmem:[#allocation2 + $0x398] sm:$0xff]  ;;  %v1721_v44 = vpack.c.bf16 %v186_v36, %v182_v35 }
  0x5e   :  { %1768 = vmatprep.subr.bf16.mxu1 %v1767_v52  ;;  %v197_v43 = vld [vmem:[#allocation2 + $0x3b8] sm:$0xff]  ;;  %v1785_v45 = vpack.c.bf16 %v188_v39, %v184_v37  ;;  %v1723_v46 = vpack.c.bf16 %v195_v41, %v191_v40  ;;  %v190_v47 = vld [vmem:[#allocation2 + $0x380] sm:$0xff]  ;;  %v192_v49 = vld [vmem:[#allocation2 + $0x390] sm:$0xff] }
  0x5f   :  { %v194_v48 = vld [vmem:[#allocation2 + $0x3a0] sm:$0xff]  ;;  %v1787_v50 = vpack.c.bf16 %v197_v43, %v193_v42  ;;  %v196_v51 = vld [vmem:[#allocation2 + $0x3b0] sm:$0xff]  ;;  %v199_v52 = vld [vmem:[#allocation2 + $0x3c8] sm:$0xff] }
  0x60   :  { %1706 = vmatpush1.bf16.msra.mxu0 %v1705_v58  ;;  %v203_v53 = vld [vmem:[#allocation2 + $0x3e8] sm:$0xff]  ;;  %v201_v54 = vld [vmem:[#allocation2 + $0x3d8] sm:$0xff]  ;;  %v1725_v56 = vpack.c.bf16 %v194_v48, %v190_v47  ;;  %v1789_v57 = vpack.c.bf16 %v196_v51, %v192_v49  ;;  %v200_v61 = vld [vmem:[#allocation2 + $0x3d0] sm:$0xff] }
  0x61   :  { %1770 = vmatpush1.bf16.msra.mxu1 %v1769_v59  ;;  %1708 = vmatprep.subr.bf16.mxu0 %v1707_v60  ;;  %v205_v55 = vld [vmem:[#allocation2 + $0x3f8] sm:$0xff]  ;;  %v1727_v58 = vpack.c.bf16 %v203_v53, %v199_v52  ;;  %v198_v59 = vld [vmem:[#allocation2 + $0x3c0] sm:$0xff]  ;;  %v204_v63 = vld [vmem:[#allocation2 + $0x3f0] sm:$0xff] }
  0x62   :  { %1772 = vmatprep.subr.bf16.mxu1 %v1771_v0  ;;  %v202_v60 = vld [vmem:[#allocation2 + $0x3e0] sm:$0xff]  ;;  %v1791_v62 = vpack.c.bf16 %v205_v55, %v201_v54  ;;  %v402_v1 = vld [vmem:[#allocation5 + $0x88] sm:$0xff]  ;;  %v1793_v5 = vpack.c.bf16 %v204_v63, %v200_v61  ;;  %v403_v12 = vld [vmem:[#allocation5 + $0x90] sm:$0xff] }
  0x63   :  { %v401_v0 = vld [vmem:[#allocation5 + $0x80] sm:$0xff]  ;;  %v434_v3 = vld [vmem:[#allocation5 + $0x188] sm:$0xff]  ;;  %v1729_v4 = vpack.c.bf16 %v202_v60, %v198_v59  ;;  %v435_v14 = vld [vmem:[#allocation5 + $0x190] sm:$0xff] }
  0x64   :  { %1710 = vmatpush1.bf16.msra.mxu0 %v1709_v6  ;;  %v433_v2 = vld [vmem:[#allocation5 + $0x180] sm:$0xff]  ;;  %v1795_v6 = vpack.c.bf16 %v402_v1, %v401_v0  ;;  %v418_v11 = vld [vmem:[#allocation5 + $0x108] sm:$0xff]  ;;  %v436_v15 = vld [vmem:[#allocation5 + $0x198] sm:$0xff] }
  0x65   :  { %1774 = vmatpush1.bf16.msra.mxu1 %v1773_v8  ;;  %1712 = vmatprep.subr.bf16.mxu0 %v1711_v9  ;;  %v385_v7 = vld [vmem:[#allocation5] sm:$0xff]  ;;  %v386_v8 = vld [vmem:[#allocation5 + $0x8] sm:$0xff]  ;;  %v1827_v10 = vpack.c.bf16 %v434_v3, %v433_v2  ;;  %v1831_v23 = vpack.c.bf16 %v436_v15, %v435_v14  ;;  %v420_v24 = vld [vmem:[#allocation5 + $0x118] sm:$0xff] }
  0x66   :  { %1776 = vmatprep.subr.bf16.mxu1 %v1775_v13  ;;  %v417_v9 = vld [vmem:[#allocation5 + $0x100] sm:$0xff]  ;;  %v404_v13 = vld [vmem:[#allocation5 + $0x98] sm:$0xff]  ;;  %v1797_v17 = vpack.c.bf16 %v386_v8, %v385_v7  ;;  %v438_v28 = vld [vmem:[#allocation5 + $0x1a8] sm:$0xff] }
  0x67   :  { %v1829_v18 = vpack.c.bf16 %v418_v11, %v417_v9  ;;  %v1799_v19 = vpack.c.bf16 %v404_v13, %v403_v12  ;;  %v405_v25 = vld [vmem:[#allocation5 + $0xa0] sm:$0xff]  ;;  %v422_v36 = vld [vmem:[#allocation5 + $0x128] sm:$0xff]  ;;  %v407_v37 = vld [vmem:[#allocation5 + $0xb0] sm:$0xff] }
  0x68   :  { %1714 = vmatpush1.bf16.msra.mxu0 %v1713_v20  ;;  %v387_v20 = vld [vmem:[#allocation5 + $0x10] sm:$0xff]  ;;  %v437_v27 = vld [vmem:[#allocation5 + $0x1a0] sm:$0xff]  ;;  %v440_v40 = vld [vmem:[#allocation5 + $0x1b8] sm:$0xff] }
  0x69   :  { %1778 = vmatpush1.bf16.msra.mxu1 %v1777_v21  ;;  %1716 = vmatprep.subr.bf16.mxu0 %v1715_v22  ;;  %v388_v21 = vld [vmem:[#allocation5 + $0x18] sm:$0xff]  ;;  %v419_v22 = vld [vmem:[#allocation5 + $0x110] sm:$0xff]  ;;  %v1835_v35 = vpack.c.bf16 %v438_v28, %v437_v27  ;;  %v409_v48 = vld [vmem:[#allocation5 + $0xc0] sm:$0xff] }
  0x6a   :  { %1780 = vmatprep.subr.bf16.mxu1 %v1779_v26  ;;  %v406_v26 = vld [vmem:[#allocation5 + $0xa8] sm:$0xff]  ;;  %v1801_v29 = vpack.c.bf16 %v388_v21, %v387_v20  ;;  %v1833_v30 = vpack.c.bf16 %v420_v24, %v419_v22  ;;  %v439_v39 = vld [vmem:[#allocation5 + $0x1b0] sm:$0xff]  ;;  %v424_v47 = vld [vmem:[#allocation5 + $0x138] sm:$0xff] }
  0x6b   :  { %v1803_v31 = vpack.c.bf16 %v406_v26, %v405_v25  ;;  %v391_v43 = vld [vmem:[#allocation5 + $0x30] sm:$0xff]  ;;  %v410_v49 = vld [vmem:[#allocation5 + $0xc8] sm:$0xff]  ;;  %v393_v55 = vld [vmem:[#allocation5 + $0x40] sm:$0xff] }
  0x6c   :  { %1718 = vmatpush1.bf16.msra.mxu0 %v1717_v32  ;;  %v389_v32 = vld [vmem:[#allocation5 + $0x20] sm:$0xff]  ;;  %v442_v51 = vld [vmem:[#allocation5 + $0x1c8] sm:$0xff]  ;;  %v1811_v54 = vpack.c.bf16 %v410_v49, %v409_v48  ;;  %v411_v60 = vld [vmem:[#allocation5 + $0xd0] sm:$0xff] }
  0x6d   :  { %1782 = vmatpush1.bf16.msra.mxu1 %v1781_v33  ;;  %1720 = vmatprep.subr.bf16.mxu0 %v1719_v34  ;;  %v390_v33 = vld [vmem:[#allocation5 + $0x28] sm:$0xff]  ;;  %v421_v34 = vld [vmem:[#allocation5 + $0x120] sm:$0xff]  ;;  %v412_v61 = vld [vmem:[#allocation5 + $0xd8] sm:$0xff] }
  0x6e   :  { %1784 = vmatprep.subr.bf16.mxu1 %v1783_v38  ;;  %v408_v38 = vld [vmem:[#allocation5 + $0xb8] sm:$0xff]  ;;  %v1805_v41 = vpack.c.bf16 %v390_v33, %v389_v32  ;;  %v426_v59 = vld [vmem:[#allocation5 + $0x148] sm:$0xff]  ;;  %v1815_v2 = vpack.c.bf16 %v412_v61, %v411_v60  ;;  %v395_v3 = vld [vmem:[#allocation5 + $0x50] sm:$0xff] }
  0x6f   :  { %v1807_v42 = vpack.c.bf16 %v408_v38, %v407_v37  ;;  %v444_v63 = vld [vmem:[#allocation5 + $0x1d8] sm:$0xff]  ;;  %v413_v8 = vld [vmem:[#allocation5 + $0xe0] sm:$0xff]  ;;  %v414_v9 = vld [vmem:[#allocation5 + $0xe8] sm:$0xff] }
  0x70   :  { %1722 = vmatpush1.bf16.msra.mxu0 %v1721_v44  ;;  %v392_v44 = vld [vmem:[#allocation5 + $0x38] sm:$0xff]  ;;  %v446_v11 = vld [vmem:[#allocation5 + $0x1e8] sm:$0xff]  ;;  %v1819_v14 = vpack.c.bf16 %v414_v9, %v413_v8  ;;  %v447_v25 = vld [vmem:[#allocation5 + $0x1f0] sm:$0xff] }
  0x71   :  { %1786 = vmatpush1.bf16.msra.mxu1 %v1785_v45  ;;  %1724 = vmatprep.subr.bf16.mxu0 %v1723_v46  ;;  %v423_v45 = vld [vmem:[#allocation5 + $0x130] sm:$0xff]  ;;  %v1839_v46 = vpack.c.bf16 %v440_v40, %v439_v39  ;;  %v1809_v52 = vpack.c.bf16 %v392_v44, %v391_v43  ;;  %v428_v7 = vld [vmem:[#allocation5 + $0x158] sm:$0xff]  ;;  %v430_v21 = vld [vmem:[#allocation5 + $0x168] sm:$0xff] }
  0x72   :  { %1788 = vmatprep.subr.bf16.mxu1 %v1787_v50  ;;  %v441_v50 = vld [vmem:[#allocation5 + $0x1c0] sm:$0xff]  ;;  %v1841_v53 = vpack.c.bf16 %v424_v47, %v423_v45  ;;  %v416_v24 = vld [vmem:[#allocation5 + $0xf8] sm:$0xff]  ;;  %v399_v28 = vld [vmem:[#allocation5 + $0x70] sm:$0xff] }
  0x73   :  { %v448_v27 = vld [vmem:[#allocation5 + $0x1f8] sm:$0xff]  ;;  %v431_v32 = vld [vmem:[#allocation5 + $0x170] sm:$0xff]  ;;  %v206_v43 = vld [vmem:[%s2392_s2] sm:$0xf] }
  0x74   :  { %1726 = vmatpush1.bf16.msra.mxu0 %v1725_v56  ;;  %v394_v56 = vld [vmem:[#allocation5 + $0x48] sm:$0xff]  ;;  %v432_v33 = vld [vmem:[#allocation5 + $0x178] sm:$0xff]  ;;  %v603_v61 = vld [vmem:[#allocation7 + $0x30] sm:$0xff] }
  0x75   :  { %1790 = vmatpush1.bf16.msra.mxu1 %v1789_v57  ;;  %1728 = vmatprep.subr.bf16.mxu0 %v1727_v58  ;;  %v425_v57 = vld [vmem:[#allocation5 + $0x140] sm:$0xff]  ;;  %v1843_v58 = vpack.c.bf16 %v442_v51, %v441_v50  ;;  %v1813_v0 = vpack.c.bf16 %v394_v56, %v393_v55  ;;  %v600_v37 = vld [vmem:[#allocation7 + $0x18] sm:$0xff] }
  0x76   :  { %1792 = vmatprep.subr.bf16.mxu1 %v1791_v62  ;;  %v443_v62 = vld [vmem:[#allocation5 + $0x1d0] sm:$0xff]  ;;  %v1845_v1 = vpack.c.bf16 %v426_v59, %v425_v57  ;;  %v604_v39 = vld [vmem:[#allocation7 + $0x38] sm:$0xff]  ;;  %v597_v55 = vld [vmem:[#allocation7] sm:$0xff] }
  0x77   :  { %v1891_v40 = vpack.c.bf16 %v604_v39, %v600_v37  ;;  %v601_v56 = vld [vmem:[#allocation7 + $0x20] sm:$0xff]  ;;  %v599_v57 = vld [vmem:[#allocation7 + $0x10] sm:$0xff] }
  0x78   :  { %1730 = vmatpush1.bf16.msra.mxu0 %v1729_v4  ;;  %v396_v4 = vld [vmem:[#allocation5 + $0x58] sm:$0xff]  ;;  %v1893_v8 = vpack.c.bf16 %v603_v61, %v599_v57  ;;  %v623_v37 = vld [vmem:[#allocation7 + $0xd0] sm:$0xff]  ;;  %v642_v57 = vld [vmem:[#allocation7 + $0x168] sm:$0xff] }
  0x79   :  { %1794 = vmatpush1.bf16.msra.mxu1 %v1793_v5  ;;  %1796 = vmatprep.subr.bf16.mxu0 %v1795_v6  ;;  %v427_v5 = vld [vmem:[#allocation5 + $0x150] sm:$0xff]  ;;  %v1847_v6 = vpack.c.bf16 %v444_v63, %v443_v62  ;;  %v1817_v12 = vpack.c.bf16 %v396_v4, %v395_v3  ;;  %v606_v62 = vld [vmem:[#allocation7 + $0x48] sm:$0xff] }
  0x7a   :  { %1828 = vmatprep.subr.bf16.mxu1 %v1827_v10  ;;  %v445_v10 = vld [vmem:[#allocation5 + $0x1e0] sm:$0xff]  ;;  %v1849_v13 = vpack.c.bf16 %v428_v7, %v427_v5  ;;  %v610_v63 = vld [vmem:[#allocation7 + $0x68] sm:$0xff]  ;;  %v1861_v5 = vpack.c.bf16 %v601_v56, %v597_v55  ;;  %v627_v39 = vld [vmem:[#allocation7 + $0xf0] sm:$0xff] }
  0x7b   :  { %304 = vmatmul.mubr.f32.vlgmr.msra.gmra.mrb[0].mxu0 %v2203_v16  ;;  %v1851_v15 = vpack.c.bf16 %v446_v11, %v445_v10  ;;  %v1863_v9 = vpack.c.bf16 %v610_v63, %v606_v62  ;;  %v605_v10 = vld [vmem:[#allocation7 + $0x40] sm:$0xff]  ;;  %v635_v55 = vld [vmem:[#allocation7 + $0x130] sm:$0xff]  ;;  %v638_v56 = vld [vmem:[#allocation7 + $0x148] sm:$0xff] }
  0x7c   :  { %375 = vmatmul.mubr.f32.vlgmr.msra.gmra.mrb[0].mxu1 %v2203_v16  ;;  %1798 = vmatpush3.bf16.msra.mxu0 %v1797_v17  ;;  %v1837_v16 = vpack.c.bf16 %v422_v36, %v421_v34  ;;  %v397_v17 = vld [vmem:[#allocation5 + $0x60] sm:$0xff]  ;;  %v1857_v34 = vpack.c.bf16 %v432_v33, %v431_v32  ;;  %v602_v36 = vld [vmem:[#allocation7 + $0x28] sm:$0xff]  ;;  %v1879_v62 = vpack.c.bf16 %v642_v57, %v638_v56 }
  0x7d   :  { %1830 = vmatpush3.bf16.msra.mxu1 %v1829_v18  ;;  %1800 = vmatprep.subr.bf16.mxu0 %v1799_v19  ;;  %v398_v18 = vld [vmem:[#allocation5 + $0x68] sm:$0xff]  ;;  %v429_v19 = vld [vmem:[#allocation5 + $0x160] sm:$0xff] }
  0x7e   :  { %1832 = vmatprep.subr.bf16.mxu1 %v1831_v23  ;;  %v1821_v20 = vpack.c.bf16 %v398_v18, %v397_v17  ;;  %v1853_v22 = vpack.c.bf16 %v430_v21, %v429_v19  ;;  %v415_v23 = vld [vmem:[#allocation5 + $0xf0] sm:$0xff]  ;;  %v609_v11 = vld [vmem:[#allocation7 + $0x60] sm:$0xff]  ;;  %v618_v17 = vld [vmem:[#allocation7 + $0xa8] sm:$0xff] }
  0x7f   :  { %v1823_v26 = vpack.c.bf16 %v416_v24, %v415_v23  ;;  %v616_v18 = vld [vmem:[#allocation7 + $0x98] sm:$0xff]  ;;  %v613_v23 = vld [vmem:[#allocation7 + $0x80] sm:$0xff] }
  0x80   :  { %1802 = vmatpush3.bf16.msra.mxu0 %v1801_v29  ;;  %v400_v29 = vld [vmem:[#allocation5 + $0x78] sm:$0xff]  ;;  %v617_v24 = vld [vmem:[#allocation7 + $0xa0] sm:$0xff] }
  0x81   :  { %1834 = vmatpush3.bf16.msra.mxu1 %v1833_v30  ;;  %1804 = vmatprep.subr.bf16.mxu0 %v1803_v31  ;;  %v1855_v30 = vpack.c.bf16 %v448_v27, %v447_v25  ;;  %v1825_v31 = vpack.c.bf16 %v400_v29, %v399_v28  ;;  %v620_v19 = vld [vmem:[#allocation7 + $0xb8] sm:$0xff]  ;;  %v615_v25 = vld [vmem:[#allocation7 + $0x90] sm:$0xff]  ;;  %v622_v28 = vld [vmem:[#allocation7 + $0xc8] sm:$0xff]  ;;  %v1869_v32 = vpack.c.bf16 %v617_v24, %v613_v23 }
  0x82   :  { %1836 = vmatprep.subr.bf16.mxu1 %v1835_v35  ;;  %v598_v35 = vld [vmem:[#allocation7 + $0x8] sm:$0xff]  ;;  %v619_v27 = vld [vmem:[#allocation7 + $0xb0] sm:$0xff]  ;;  %v637_v63 = vld [vmem:[#allocation7 + $0x140] sm:$0xff] }
  0x83   :  { %v1859_v38 = vpack.c.bf16 %v602_v36, %v598_v35  ;;  %v626_v29 = vld [vmem:[#allocation7 + $0xe8] sm:$0xff]  ;;  %v1901_v33 = vpack.c.bf16 %v619_v27, %v615_v25  ;;  %v621_v35 = vld [vmem:[#allocation7 + $0xc0] sm:$0xff]  ;;  %v660_v23 = vld [vmem:[#allocation7 + $0x1f8] sm:$0xff] }
  0x84   :  { %1806 = vmatpush3.bf16.msra.mxu0 %v1805_v41  ;;  %v208_v41 = vlaneseq  ;;  %v625_v36 = vld [vmem:[#allocation7 + $0xe0] sm:$0xff] }
  0x85   :  { %1838 = vmatpush3.bf16.msra.mxu1 %v1837_v16  ;;  %1808 = vmatprep.subr.bf16.mxu0 %v1807_v42  ;;  %v653_v24 = vld [vmem:[#allocation7 + $0x1c0] sm:$0xff] }
  0x86   :  { %1840 = vmatprep.subr.bf16.mxu1 %v1839_v46  ;;  %v2209_v16 = vshrl.u32 %v208_v41, 7  ;;  %v634_v41 = vld [vmem:[#allocation7 + $0x128] sm:$0xff]  ;;  %v657_v25 = vld [vmem:[#allocation7 + $0x1e0] sm:$0xff] }
  0x87   :  { %v1889_v27 = vpack.c.bf16 %v657_v25, %v653_v24 }
  0x88   :  { %1810 = vmatpush3.bf16.msra.mxu0 %v1809_v52  ;;  %v210_v42 = vsub.s32 0, %v2209_v16  ;;  %v218_v44 = vsub.s32 2, %v2209_v16  ;;  %v214_v45 = vsub.s32 1, %v2209_v16  ;;  %v222_v46 = vsub.s32 3, %v2209_v16 }
  0x89   :  { %1842 = vmatpush3.bf16.msra.mxu1 %v1841_v53  ;;  %1812 = vmatprep.subr.bf16.mxu0 %v1811_v54 }
  0x8a   :  { %1844 = vmatprep.subr.bf16.mxu1 %v1843_v58  ;;  %v211_v47 = vrot.slane %v206_v43, %v210_v42  ;;  %v219_v48 = vrot.slane %v206_v43, %v218_v44  ;;  %v215_v49 = vrot.slane %v206_v43, %v214_v45  ;;  %v223_v50 = vrot.slane %v206_v43, %v222_v46  ;;  %v632_v43 = vld [vmem:[#allocation7 + $0x118] sm:$0xff] }
  0x8c   :  { %1814 = vmatpush3.bf16.msra.mxu0 %v1813_v0 }
  0x8d   :  { %1846 = vmatpush3.bf16.msra.mxu1 %v1845_v1  ;;  %1816 = vmatprep.subr.bf16.mxu0 %v1815_v2  ;;  %v608_v1 = vld [vmem:[#allocation7 + $0x58] sm:$0xff] }
  0x8e   :  { %1848 = vmatprep.subr.bf16.mxu1 %v1847_v6  ;;  %v612_v2 = vld [vmem:[#allocation7 + $0x78] sm:$0xff] }
  0x90   :  { %1818 = vmatpush3.bf16.msra.mxu0 %v1817_v12  ;;  %v607_v12 = vld [vmem:[#allocation7 + $0x50] sm:$0xff] }
  0x91   :  { %1850 = vmatpush3.bf16.msra.mxu1 %v1849_v13  ;;  %1820 = vmatprep.subr.bf16.mxu0 %v1819_v14  ;;  %v1895_v13 = vpack.c.bf16 %v612_v2, %v608_v1  ;;  %v611_v14 = vld [vmem:[#allocation7 + $0x70] sm:$0xff] }
  0x92   :  { %1852 = vmatprep.subr.bf16.mxu1 %v1851_v15  ;;  %v614_v15 = vld [vmem:[#allocation7 + $0x88] sm:$0xff]  ;;  %v1897_v21 = vpack.c.bf16 %v611_v14, %v607_v12  ;;  %v639_v2 = vld [vmem:[#allocation7 + $0x150] sm:$0xff] }
  0x93   :  { %v647_v14 = vld [vmem:[#allocation7 + $0x190] sm:$0xff] }
  0x94   :  { %1822 = vmatpush3.bf16.msra.mxu0 %v1821_v20  ;;  %v1865_v20 = vpack.c.bf16 %v609_v11, %v605_v10  ;;  %v652_v10 = vld [vmem:[#allocation7 + $0x1b8] sm:$0xff]  ;;  %v645_v11 = vld [vmem:[#allocation7 + $0x180] sm:$0xff] }
  0x95   :  { %1854 = vmatpush3.bf16.msra.mxu1 %v1853_v22  ;;  %1824 = vmatprep.subr.bf16.mxu0 %v1823_v26  ;;  %v1867_v22 = vpack.c.bf16 %v618_v17, %v614_v15  ;;  %v1899_v26 = vpack.c.bf16 %v620_v19, %v616_v18  ;;  %v651_v15 = vld [vmem:[#allocation7 + $0x1b0] sm:$0xff]  ;;  %v654_v19 = vld [vmem:[#allocation7 + $0x1c8] sm:$0xff] }
  0x96   :  { %1856 = vmatprep.subr.bf16.mxu1 %v1855_v30  ;;  %v624_v30 = vld [vmem:[#allocation7 + $0xd8] sm:$0xff]  ;;  %v1917_v18 = vpack.c.bf16 %v651_v15, %v647_v14 }
  0x98   :  { %1826 = vmatpush3.bf16.msra.mxu0 %v1825_v31  ;;  %v628_v31 = vld [vmem:[#allocation7 + $0xf8] sm:$0xff] }
  0x99   :  { %1858 = vmatpush3.bf16.msra.mxu1 %v1857_v34  ;;  %1860 = vmatprep.subr.bf16.mxu0 %v1859_v38  ;;  %v1871_v34 = vpack.c.bf16 %v626_v29, %v622_v28  ;;  %v1903_v38 = vpack.c.bf16 %v628_v31, %v624_v30  ;;  %v655_v28 = vld [vmem:[#allocation7 + $0x1d0] sm:$0xff]  ;;  %v2102_v31 = vmov 0.0  }
  0x9a   :  { %1892 = vmatprep.subr.bf16.mxu1 %v1891_v40  ;;  %v630_v40 = vld [vmem:[#allocation7 + $0x108] sm:$0xff]  ;;  %v659_v29 = vld [vmem:[#allocation7 + $0x1f0] sm:$0xff] }
  0x9b   :  { %v1921_v30 = vpack.c.bf16 %v659_v29, %v655_v28 }
 0x14e   :  { %v305_v51 = vpop.f32.mrb[0].mxu0 }
 0x14f   :  { %v306_v52 = vadd.f32 %v305_v51, %v211_v47  ;;  %v376_v53 = vpop.f32.mrb[0].mxu1  ;;  %v307_v54 = vpop.f32.mrb[1].mxu0  ;;  %v636_v47 = vld [vmem:[#allocation7 + $0x138] sm:$0xff]  ;;  %v629_v51 = vld [vmem:[#allocation7 + $0x100] sm:$0xff] }
 0x150   :  { %v377_v58 = vadd.f32 %v376_v53, %v219_v48  ;;  %v308_v59 = vadd.f32 %v307_v54, %v215_v49  ;;  %v378_v60 = vpop.f32.mrb[1].mxu1  ;;  %v1873_v48 = vpack.c.bf16 %v625_v36, %v621_v35  ;;  %v1905_v49 = vpack.c.bf16 %v627_v39, %v623_v37  ;;  %v631_v53 = vld [vmem:[#allocation7 + $0x110] sm:$0xff] }
 0x151   :  { %v379_v0 = vadd.f32 %v378_v60, %v223_v50  ;;  %v381_v6 = vmax.f32 %v306_v52, 0.0  ;;  %v1875_v50 = vpack.c.bf16 %v634_v41, %v630_v40  ;;  %v633_v52 = vld [vmem:[#allocation7 + $0x120] sm:$0xff]  ;;  %v1907_v54 = vpack.c.bf16 %v636_v47, %v632_v43 }
 0x152   :  { %v383_v3 = vmax.f32 %v377_v58, 0.0  ;;  %v382_v4 = vmax.f32 %v308_v59, 0.0  ;;  %v640_v58 = vld [vmem:[#allocation7 + $0x158] sm:$0xff]  ;;  %v1877_v60 = vpack.c.bf16 %v633_v52, %v629_v51  ;;  %v1909_v61 = vpack.c.bf16 %v635_v55, %v631_v53  ;;  %v2234_v43 = vld [vmem:[%s2396_s6] sm:$0xf] }
 0x153   :  { %v384_v7 = vmax.f32 %v379_v0, 0.0  ;;  %v644_v59 = vld [vmem:[#allocation7 + $0x178] sm:$0xff]  ;;  %v641_v0 = vld [vmem:[#allocation7 + $0x160] sm:$0xff]  ;;  %v666_v47 = vrot.slane %v2234_v43, %v210_v42  ;;  %v670_v15 = vrot.slane %v2234_v43, %v214_v45 }
 0x154   :  { %520 = vmatprep.mubr.f32.mxu0 %v382_v4  ;;  %v1911_v1 = vpack.c.bf16 %v644_v59, %v640_v58  ;;  %v1881_v4 = vpack.c.bf16 %v641_v0, %v637_v63  ;;  %v826_v63 = vld [vmem:[%s2397_s7 + $0x8] sm:$0xff]  ;;  %v827_v0 = vld [vmem:[%s2397_s7 + $0x10] sm:$0xff] }
 0x155   :  { %590 = vmatprep.mubr.f32.mxu1 %v384_v7  ;;  %521 = vmatmul.mubr.f32.vlgmr.msra.gmra.mrb[2].mxu0 %v381_v6  ;;  %v646_v6 = vld [vmem:[#allocation7 + $0x188] sm:$0xff] }
 0x156   :  { %591 = vmatmul.mubr.f32.vlgmr.msra.gmra.mrb[2].mxu1 %v383_v3  ;;  %1862 = vmatpush1.bf16.msra.mxu0 %v1861_v5  ;;  %v643_v3 = vld [vmem:[#allocation7 + $0x170] sm:$0xff]  ;;  %v650_v7 = vld [vmem:[#allocation7 + $0x1a8] sm:$0xff] }
 0x157   :  { %1894 = vmatpush1.bf16.msra.mxu1 %v1893_v8  ;;  %1864 = vmatprep.subr.bf16.mxu0 %v1863_v9  ;;  %v1913_v5 = vpack.c.bf16 %v643_v3, %v639_v2  ;;  %v648_v8 = vld [vmem:[#allocation7 + $0x198] sm:$0xff]  ;;  %v1883_v9 = vpack.c.bf16 %v650_v7, %v646_v6 }
 0x158   :  { %1896 = vmatprep.subr.bf16.mxu1 %v1895_v13  ;;  %v1915_v12 = vpack.c.bf16 %v652_v10, %v648_v8  ;;  %v649_v13 = vld [vmem:[#allocation7 + $0x1a0] sm:$0xff]  ;;  %747 = vmatprep.mubr.f32.mxu0 %v2102_v31  ;;  %v828_v3 = vld [vmem:[%s2397_s7 + $0x18] sm:$0xff] }
 0x159   :  { %v1885_v17 = vpack.c.bf16 %v649_v13, %v645_v11  ;;  %818 = vmatprep.mubr.f32.mxu1 %v2102_v31  ;;  %v851_v8 = vld [vmem:[%s2398_s8] sm:$0xff]  ;;  %v853_v11 = vld [vmem:[%s2398_s8 + $0x10] sm:$0xff] }
 0x15a   :  { %1866 = vmatpush1.bf16.msra.mxu0 %v1865_v20  ;;  %v658_v20 = vld [vmem:[#allocation7 + $0x1e8] sm:$0xff] }
 0x15b   :  { %1898 = vmatpush1.bf16.msra.mxu1 %v1897_v21  ;;  %1868 = vmatprep.subr.bf16.mxu0 %v1867_v22  ;;  %v656_v21 = vld [vmem:[#allocation7 + $0x1d8] sm:$0xff]  ;;  %v1887_v22 = vpack.c.bf16 %v658_v20, %v654_v19 }
 0x15c   :  { %1900 = vmatprep.subr.bf16.mxu1 %v1899_v26  ;;  %v1919_v26 = vpack.c.bf16 %v660_v23, %v656_v21 }
 0x15e   :  { %1870 = vmatpush1.bf16.msra.mxu0 %v1869_v32 }
 0x15f   :  { %1902 = vmatpush1.bf16.msra.mxu1 %v1901_v33  ;;  %1872 = vmatprep.subr.bf16.mxu0 %v1871_v34  ;;  %v1476_v34 = vld [vmem:[%s2394_s4] ss:$0 sm:$0xff]  ;;  %s2103_s4 = smov 64  }
 0x160   :  { %1904 = vmatprep.subr.bf16.mxu1 %v1903_v38 }
 0x162   :  { %1874 = vmatpush1.bf16.msra.mxu0 %v1873_v48 }
 0x163   :  { %1906 = vmatpush1.bf16.msra.mxu1 %v1905_v49  ;;  %1876 = vmatprep.subr.bf16.mxu0 %v1875_v50 }
 0x164   :  { %1908 = vmatprep.subr.bf16.mxu1 %v1907_v54 }
 0x166   :  { %1878 = vmatpush1.bf16.msra.mxu0 %v1877_v60 }
 0x167   :  { %1910 = vmatpush1.bf16.msra.mxu1 %v1909_v61  ;;  %1880 = vmatprep.subr.bf16.mxu0 %v1879_v62  ;;  %v825_v62 = vld [vmem:[%s2397_s7] sm:$0xff] }
 0x168   :  { %1912 = vmatprep.subr.bf16.mxu1 %v1911_v1  ;;  %v2104_v1 = vmov 0.0|0.0   ;;  %v2255_v2 = vpack.c.bf16 %v826_v63, %v825_v62 }
 0x16a   :  { %1882 = vmatpush1.bf16.msra.mxu0 %v1881_v4  ;;  %v2266_v4 = vpack.c.bf16 %v828_v3, %v827_v0  ;;  %v1197_v3 = vld [vmem:[%s2398_s8 + $0x48] sm:$0xff] }
 0x16b   :  { %1914 = vmatpush1.bf16.msra.mxu1 %v1913_v5  ;;  %1884 = vmatprep.subr.bf16.mxu0 %v1883_v9  ;;  %v852_v9 = vld [vmem:[%s2398_s8 + $0x8] sm:$0xff] }
 0x16c   :  { %1916 = vmatprep.subr.bf16.mxu1 %v1915_v12  ;;  %v1936_v10 = vpack.c.bf16 %v852_v9, %v851_v8  ;;  %v854_v12 = vld [vmem:[%s2398_s8 + $0x18] sm:$0xff] }
 0x16d   :  { %v1939_v14 = vpack.c.bf16 %v854_v12, %v853_v11  ;;  %v678_v12 = vrot.slane %v2234_v43, %v222_v46 }
 0x16e   :  { %1886 = vmatpush1.bf16.msra.mxu0 %v1885_v17 }
 0x16f   :  { %1918 = vmatpush1.bf16.msra.mxu1 %v1917_v18  ;;  %1888 = vmatprep.subr.bf16.mxu0 %v1887_v22 }
 0x170   :  { %1920 = vmatprep.subr.bf16.mxu1 %v1919_v26 }
 0x172   :  { %1890 = vmatpush1.bf16.msra.mxu0 %v1889_v27 }
 0x173   :  { %1922 = vmatpush1.bf16.msra.mxu1 %v1921_v30  ;;  %1923 = vmatprep.subr.bf16.mxu0 %v2104_v1 }
 0x174   :  { %1929 = vmatprep.subr.bf16.mxu1 %v2104_v1 }
 0x228   :  { %v1517_v32 = vpop.f32.mrb[2].mxu0 }
 0x229   :  { %v1552_v33 = vpop.f32.mrb[2].mxu1  ;;  %v1518_v35 = vpop.f32.mrb[3].mxu0 }
 0x22a   :  { %v1519_v36 = vadd.f32 %v1518_v35, %v1517_v32  ;;  %v1553_v37 = vpop.f32.mrb[3].mxu1  ;;  %v956_v35 = vld [vmem:[%s2398_s8 + $0x30] sm:$0xff] }
 0x22b   :  { %v1554_v38 = vadd.f32 %v1553_v37, %v1552_v33  ;;  %v954_v33 = vld [vmem:[%s2398_s8 + $0x20] sm:$0xff]  ;;  %v957_v37 = vld [vmem:[%s2398_s8 + $0x38] sm:$0xff] }
 0x22c   :  { %v523_v39 = vadd.f32 %v1519_v36, %v1476_v34  ;;  %v955_v34 = vld [vmem:[%s2398_s8 + $0x28] sm:$0xff] }
 0x22d   :  { %v1930_v36 = vpack.c.bf16 %v955_v34, %v954_v33 }
 0x22e   :  { %v593_v40 = vadd.f32 %v1554_v38, %v523_v39  ;;  %v1933_v38 = vpack.c.bf16 %v957_v37, %v956_v35  ;;  %v1484_v37 = vld [vmem:[%s2399_s9] ss:$0 sm:$0xff] }
 0x230   :  { %v596_v41 = vmax.f32 %v593_v40, 0.0 }
 0x232   :  { %748 = vmatmul.mubr.f32.vlgmr.msra.gmra.mrb[4].mxu0 %v596_v41  ;;  %819 = vmatmul.mubr.f32.vlgmr.msra.gmra.mrb[4].mxu1 %v596_v41 }
 0x233   :  { %1598 = vmatprep.mubr.msk.f32.mxu0 %vm2105_vm0, %v2102_v31  ;;  %1609 = vmatprep.mubr.msk.f32.mxu1 %vm2105_vm0, %v2102_v31 }
 0x234   :  { %1925 = vmatpush3.bf16.msra.mxu0 %v2255_v2  ;;  %1931 = vmatpush3.bf16.msra.mxu1 %v1930_v36 }
 0x235   :  { %1926 = vmatprep.subr.bf16.mxu0 %v2104_v1  ;;  %1932 = vmatprep.subr.bf16.mxu1 %v2104_v1 }
 0x238   :  { %1928 = vmatpush3.bf16.msra.mxu0 %v2266_v4  ;;  %1934 = vmatpush3.bf16.msra.mxu1 %v1933_v38 }
 0x239   :  { %1935 = vmatprep.subr.bf16.mxu0 %v2104_v1  ;;  %1941 = vmatprep.subr.bf16.mxu1 %v2104_v1 }
 0x305   :  { %v749_v48 = vpop.f32.mrb[4].mxu0  ;;  %v2239_v49 = vpop.f32.mrb[4].mxu1 }
 0x306   :  { %v750_v50 = vadd.f32 %v749_v48, %v666_v47  ;;  %v751_v51 = vpop.f32.mrb[5].mxu0  ;;  %v2241_v52 = vpop.f32.mrb[5].mxu1 }
 0x307   :  { %v752_v17 = vadd.f32 %v751_v51, %v670_v15 }
 0x308   :  { %1977 = vtanh.f32 %v750_v50  ;;  %v829_v54 = vmul.f32 0.5, %v750_v50 }
 0x30a   :  { %1979 = vtanh.f32 %v829_v54 }
 0x312   :  { %v1978_v53 = vpop.eup %1977 }
 0x313   :  { %836 = vrot.lane.b32.xlu0 %v1978_v53, %s2103_s4  ;;  %v674_v53 = vrot.slane %v2234_v43, %v218_v44 }
 0x314   :  { %v1980_v55 = vpop.eup %1979 }
 0x315   :  { %v831_v56 = vmul.f32 0.5, %v1980_v55  ;;  %v821_v54 = vadd.f32 %v2239_v49, %v674_v53  ;;  %v1196_v49 = vld [vmem:[%s2398_s8 + $0x40] sm:$0xff] }
 0x317   :  { %v832_v57 = vadd.f32 0.5, %v831_v56 }
 0x319   :  { %v834_v42 = vmul.f32 0.0, %v832_v57 }
 0x385   :  { %v837_v58 = vpop.permute.xlu0 %836 }
 0x386   :  { %v839_v59 = vmul.f32 %v837_v58, %v832_v57 }
 0x388   :  { %841 = vrot.lane.b32.xlu0 %v839_v59, %s2100_s14 }
 0x3fa   :  { %v842_v60 = vpop.permute.xlu0 %841 }
 0x3fb   :  { %v844_v61 = vadd.f32 %v842_v60, %v834_v42 }
 0x3fd   :  { %1981 = vtanh.f32 %v844_v61 }
 0x407   :  { %v1982_v5 = vpop.eup %1981 }
 0x408   :  { %847 = vrot.lane.b32.xlu1 %v1982_v5, %s2103_s4  ;;  %v1948_v5 = vpack.c.bf16 %v1197_v3, %v1196_v49 }
 0x47a   :  { %v848_v6 = vpop.permute.xlu1 %847 }
 0x47b   :  { %v850_v7 = vmul.f32 %v848_v6, %v832_v57  ;;  %v1199_v6 = vld [vmem:[%s2398_s8 + $0x58] sm:$0xff] }
 0x47d   :  { %856 = vrot.lane.b32.xlu1 %v850_v7, %s2100_s14 }
 0x4ef   :  { %v857_v13 = vpop.permute.xlu1 %856 }
 0x4f0   :  { %1599 = vmatmul.mubr.msk.f32.vlgmr.msra.gmra.mrb[6].mxu0 %vm858_vm1, %v857_v13 }
 0x4f1   :  { %1937 = vmatpush3.bf16.msra.mxu0 %v1936_v10  ;;  %1620 = vmatprep.mubr.msk.f32.mxu0 %vm2105_vm0, %v2102_v31 }
 0x4f2   :  { %1938 = vmatprep.subr.bf16.mxu0 %v2104_v1 }
 0x4f5   :  { %1940 = vmatpush3.bf16.msra.mxu0 %v1939_v14 }
 0x4f6   :  { %1947 = vmatprep.subr.bf16.mxu0 %v2104_v1 }
 0x4f8   :  { %1621 = vmatmul.mubr.msk.f32.vlgmr.msra.gmra.mrb[8].mxu0 %vm858_vm1, %v857_v13  ;;  %v823_v13 = vadd.f32 %v2241_v52, %v678_v12 }
 0x4f9   :  { %1642 = vmatprep.mubr.msk.f32.mxu0 %vm2105_vm0, %v2102_v31  ;;  %1949 = vmatpush3.bf16.msra.mxu0 %v1948_v5 }
 0x4fa   :  { %1950 = vmatprep.subr.bf16.mxu0 %v2104_v1 }
 0x5c3   :  { %v927_v18 = vpop.f32.mrb[6].mxu0 }
 0x5c4   :  { %v931_v19 = vadd.f32 %v927_v18, %v752_v17  ;;  %v1600_v20 = vpop.f32.mrb[7].mxu0 }
 0x5c6   :  { %1983 = vtanh.f32 %v931_v19  ;;  %v932_v24 = vmul.f32 0.5, %v931_v19 }
 0x5c8   :  { %1985 = vtanh.f32 %v932_v24 }
 0x5cb   :  { %v1099_v21 = vpop.f32.mrb[8].mxu0 }
 0x5cc   :  { %v1622_v22 = vpop.f32.mrb[9].mxu0 }
 0x5d0   :  { %v1984_v23 = vpop.eup %1983 }
 0x5d1   :  { %939 = vrot.lane.b32.xlu0 %v1984_v23, %s2103_s4 }
 0x5d2   :  { %v1986_v25 = vpop.eup %1985 }
 0x5d3   :  { %v934_v26 = vmul.f32 0.5, %v1986_v25 }
 0x5d5   :  { %v935_v27 = vadd.f32 0.5, %v934_v26  ;;  %v1369_v26 = vld [vmem:[%s2398_s8 + $0x60] sm:$0xff] }
 0x5d7   :  { %v937_v45 = vmul.f32 %v935_v27, %v844_v61 }
 0x643   :  { %v940_v28 = vpop.permute.xlu0 %939 }
 0x644   :  { %v942_v29 = vmul.f32 %v940_v28, %v935_v27  ;;  %v1371_v28 = vld [vmem:[%s2398_s8 + $0x70] sm:$0xff] }
 0x646   :  { %944 = vrot.lane.b32.xlu1 %v942_v29, %s2100_s14 }
 0x6b8   :  { %v945_v30 = vpop.permute.xlu1 %944 }
 0x6b9   :  { %v947_v32 = vadd.f32 %v945_v30, %v937_v45  ;;  %v1372_v45 = vld [vmem:[%s2398_s8 + $0x78] sm:$0xff] }
 0x6ba   :  { %v1963_v30 = vpack.c.bf16 %v1372_v45, %v1371_v28 }
 0x6bb   :  { %1987 = vtanh.f32 %v947_v32 }
 0x6c5   :  { %v1988_v39 = vpop.eup %1987 }
 0x6c6   :  { %950 = vrot.lane.b32.xlu0 %v1988_v39, %s2103_s4 }
 0x738   :  { %v951_v40 = vpop.permute.xlu0 %950 }
 0x739   :  { %v953_v41 = vmul.f32 %v951_v40, %v935_v27  ;;  %v1370_v27 = vld [vmem:[%s2398_s8 + $0x68] sm:$0xff] }
 0x73a   :  { %v1960_v29 = vpack.c.bf16 %v1370_v27, %v1369_v26 }
 0x73b   :  { %959 = vrot.lane.b32.xlu1 %v953_v41, %s2100_s14 }
 0x7ad   :  { %v960_v47 = vpop.permute.xlu1 %959 }
 0x7ae   :  { %1610 = vmatmul.mubr.msk.f32.vlgmr.msra.gmra.mrb[6].mxu1 %vm858_vm1, %v960_v47 }
 0x7af   :  { %1943 = vmatpush3.bf16.msra.mxu1 %v2255_v2  ;;  %1631 = vmatprep.mubr.msk.f32.mxu1 %vm2105_vm0, %v2102_v31 }
 0x7b0   :  { %1944 = vmatprep.subr.bf16.mxu1 %v2104_v1 }
 0x7b3   :  { %1946 = vmatpush3.bf16.msra.mxu1 %v2266_v4 }
 0x7b4   :  { %1953 = vmatprep.subr.bf16.mxu1 %v2104_v1 }
 0x7b6   :  { %1632 = vmatmul.mubr.msk.f32.vlgmr.msra.gmra.mrb[8].mxu1 %vm858_vm1, %v960_v47 }
 0x7b7   :  { %1955 = vmatpush3.bf16.msra.mxu1 %v2255_v2  ;;  %1653 = vmatprep.mubr.msk.f32.mxu1 %vm2105_vm0, %v2102_v31 }
 0x7b8   :  { %1956 = vmatprep.subr.bf16.mxu1 %v2104_v1 }
 0x7bb   :  { %1958 = vmatpush3.bf16.msra.mxu1 %v2266_v4  ;;  %v1198_v4 = vld [vmem:[%s2398_s8 + $0x50] sm:$0xff]  ;;  %s2106_s8 = smov [#allocation8]  }
 0x7bc   :  { %v1951_v7 = vpack.c.bf16 %v1199_v6, %v1198_v4  ;;  %s1465_s1 = sshll.u32 %s2106_s8, 4  ;;  %s1466_s1 = int_to_ptr.vmem [resolvable:$true] %s1465_s1 }
 0x7bd   :  { %p2072_p11 = scmp.lt.s32.totalorder %s1466_s1, %s1466_s1 }
 0x7be   :  { %1952 = vmatpush3.bf16.msra.mxu0 %v1951_v7 }
 0x7bf   :  { %1959 = vmatprep.subr.bf16.mxu0 %v2104_v1 }
 0x881   :  { %v1029_v48 = vpop.f32.mrb[6].mxu1 }
 0x882   :  { %v1100_v50 = vadd.f32 %v1099_v21, %v1029_v48  ;;  %v1611_v51 = vpop.f32.mrb[7].mxu1 }
 0x889   :  { %v1169_v55 = vpop.f32.mrb[8].mxu1 }
 0x88a   :  { %v1173_v56 = vadd.f32 %v1169_v55, %v821_v54  ;;  %v1633_v57 = vpop.f32.mrb[9].mxu1 }
 0x88c   :  { %1989 = vtanh.f32 %v1173_v56  ;;  %v1174_v59 = vmul.f32 0.5, %v1173_v56 }
 0x88e   :  { %1991 = vtanh.f32 %v1174_v59 }
 0x896   :  { %v1990_v58 = vpop.eup %1989 }
 0x897   :  { %1181 = vrot.lane.b32.xlu0 %v1990_v58, %s2103_s4 }
 0x898   :  { %v1992_v42 = vpop.eup %1991 }
 0x899   :  { %v1176_v60 = vmul.f32 0.5, %v1992_v42 }
 0x89b   :  { %v1177_v61 = vadd.f32 0.5, %v1176_v60 }
 0x89d   :  { %v1179_v0 = vmul.f32 %v1177_v61, %v947_v32 }
 0x909   :  { %v1182_v62 = vpop.permute.xlu0 %1181 }
 0x90a   :  { %v1184_v63 = vmul.f32 %v1182_v62, %v1177_v61 }
 0x90c   :  { %1186 = vrot.lane.b32.xlu1 %v1184_v63, %s2100_s14 }
 0x97e   :  { %v1187_v44 = vpop.permute.xlu1 %1186 }
 0x97f   :  { %v1189_v2 = vadd.f32 %v1187_v44, %v1179_v0 }
 0x981   :  { %1993 = vtanh.f32 %v1189_v2 }
 0x98b   :  { %v1994_v8 = vpop.eup %1993 }
 0x98c   :  { %1192 = vrot.lane.b32.xlu0 %v1994_v8, %s2103_s4 }
 0x9fe   :  { %v1193_v9 = vpop.permute.xlu0 %1192 }
 0x9ff   :  { %v1195_v10 = vmul.f32 %v1193_v9, %v1177_v61 }
 0xa01   :  { %1201 = vrot.lane.b32.xlu1 %v1195_v10, %s2100_s14 }
 0xa73   :  { %v1202_v11 = vpop.permute.xlu1 %1201 }
 0xa74   :  { %1643 = vmatmul.mubr.msk.f32.vlgmr.msra.gmra.mrb[10].mxu0 %vm858_vm1, %v1202_v11  ;;  %1654 = vmatmul.mubr.msk.f32.vlgmr.msra.gmra.mrb[10].mxu1 %vm858_vm1, %v1202_v11 }
 0xa75   :  { %1664 = vmatprep.mubr.msk.f32.mxu0 %vm2105_vm0, %v2102_v31  ;;  %1961 = vmatpush3.bf16.msra.mxu0 %v1960_v29 }
 0xa76   :  { %1962 = vmatprep.subr.bf16.mxu0 %v2104_v1 }
 0xa79   :  { %1964 = vmatpush3.bf16.msra.mxu0 %v1963_v30 }
 0xb47   :  { %v1271_v14 = vpop.f32.mrb[10].mxu0  ;;  %v1342_v15 = vpop.f32.mrb[10].mxu1 }
 0xb48   :  { %v1275_v17 = vadd.f32 %v1271_v14, %v1100_v50  ;;  %v1346_v18 = vadd.f32 %v1342_v15, %v823_v13  ;;  %v1644_v19 = vpop.f32.mrb[11].mxu0  ;;  %v1655_v20 = vpop.f32.mrb[11].mxu1 }
 0xb4a   :  { %1995 = vtanh.f32 %v1346_v18  ;;  %v1347_v22 = vmul.f32 0.5, %v1346_v18 }
 0xb4c   :  { %1997 = vtanh.f32 %v1347_v22 }
 0xb54   :  { %v1996_v21 = vpop.eup %1995 }
 0xb55   :  { %1354 = vrot.lane.b32.xlu0 %v1996_v21, %s2103_s4 }
 0xb56   :  { %v1998_v23 = vpop.eup %1997 }
 0xb57   :  { %v1349_v31 = vmul.f32 0.5, %v1998_v23 }
 0xb59   :  { %v1350_v24 = vadd.f32 0.5, %v1349_v31 }
 0xb5b   :  { %v1352_v46 = vmul.f32 %v1350_v24, %v1189_v2 }
 0xbc7   :  { %v1355_v16 = vpop.permute.xlu0 %1354 }
 0xbc8   :  { %v1357_v25 = vmul.f32 %v1355_v16, %v1350_v24 }
 0xbca   :  { %1359 = vrot.lane.b32.xlu1 %v1357_v25, %s2100_s14 }
 0xc3c   :  { %v1360_v43 = vpop.permute.xlu1 %1359 }
 0xc3d   :  { %v1362_v52 = vadd.f32 %v1360_v43, %v1352_v46 }
 0xc3f   :  { %1999 = vtanh.f32 %v1362_v52 }
 0xc49   :  { %v2000_v32 = vpop.eup %1999 }
 0xc4a   :  { %1365 = vrot.lane.b32.xlu0 %v2000_v32, %s2103_s4  ;;  %s2067_s4 = scalar_lea.vmem %s1466_s1, 32 }
 0xc4b   :  { %p2068_p10 = scmp.ne.s32.totalorder %s1466_s1, %s2067_s4  ;;  %p2073_p12 = scmp.lt.s32.totalorder %s2067_s4, %s2067_s4 }
 0xc4d   :  { %p2074_p13 = por %p2073_p12, %p2072_p11 }
 0xc4f   :  { %p2075_p0 = pnand %p2074_p13, %p2068_p10 }
 0xcbc   :  { %v1366_v33 = vpop.permute.xlu0 %1365 }
 0xcbd   :  { %v1368_v34 = vmul.f32 %v1366_v33, %v1350_v24 }
 0xcbf   :  { %1374 = vrot.lane.b32.xlu1 %v1368_v34, %s2100_s14 }
 0xd31   :  { %v1375_v35 = vpop.permute.xlu1 %1374 }
 0xd32   :  { %1665 = vmatmul.mubr.msk.f32.vlgmr.msra.gmra.mrb[12].mxu0 %vm858_vm1, %v1375_v35 }
 0xe05   :  { %v1444_v36 = vpop.f32.mrb[12].mxu0 }
 0xe06   :  { %v1448_v38 = vadd.f32 %v1444_v36, %v1275_v17  ;;  %v1666_v1 = vpop.f32.mrb[13].mxu0 }
 0xe08   :  { %v1456_v39 = vadd.f32 %v1484_v37, %v1448_v38 }
 0xe0a   :  { %1458 = vst.msk [vmem:[#allocation8] sm:$0x3] %vm1457_vm2, %v1456_v39 }
 0xe0b   :  { %2078 = shalt.err (!%p2075_p0)
}
 0xe0c   :  { %s2079_s5 = scalar_lea.hbm %s2400_s10, 32 }
 0xe0d   :  { %p2080_p1 = scmp.ne.s32.totalorder %s2400_s10, %s2079_s5  ;;  %p2083_p2 = scmp.lt.u32.totalorder %s2079_s5, %s2400_s10 }
 0xe0f   :  { %p2085_p3 = pnand %p2083_p2, %p2080_p1 }
 0xe11   :  { %2088 = shalt.err (!%p2085_p3)
}
 0xe12   :  { %1468 = dma.vmem_to_hbm [thread:$0]  %s1466_s1, 32, %s2400_s10, [#allocation4]  }
 0xe13   :  { %2093 = dma.done.wait [#allocation4], 32  }
 0xe14   :  { %2094 = vsyncadd [#allocation4], 4294967264 }
 0xe15   :  { %1472 = vsyncpa [#allocation3], 1 }
 0xe16   :  { %1473 = vsyncpa [#allocation6], 1 }
 0xe17   :  { %1474 = vsyncpa [#allocation4], 1 }

</bundles_post_ra>
